<compile_context>
chip_gen: v5e
topology: v5e:2x2
jax: 0.10.0
libtpu: 0.0.40
codegen_flags: <defaults>
</compile_context>

<pallas_src>
import numpy as np
import jax
import jax.numpy as jnp
from jax import lax
from jax.experimental import pallas as pl
from jax.experimental.pallas import tpu as pltpu

# Small synthetic sizes consistent with the module's constructor arguments.
B = 2     # batch_size
S = 8     # max_sequence_length
I = 16    # input_size
H = 32    # LSTM hidden size (bidirectional -> 2H features out of the LSTM)
F = 32    # fully-connected hidden size
C = 2     # number of classes (logits)
LANE = 128  # TPU lane width; logits are written into a lane-dense padded slab

# Weight-slab row offsets (all multiples of 8 -> sublane-tile aligned slices).
_OFF_WHH = 0          # rows [0,   H)   : W_hh forward, lanes [0, 4H)
_OFF_W1F = H          # rows [H,  2H)   : W1[:H],       lanes [0, F)
_OFF_W1B = 2 * H      # rows [2H, 3H)   : W1[H:],       lanes [0, F)
_OFF_W2 = 3 * H       # rows [3H, 3H+F) : W2 padded,    lanes [0, LANE)
_WSLAB_ROWS = 3 * H + F          # = 128
_BSLAB_ROWS = 8                  # row 0: LSTM bias (8H); row 1: b1; row 2: b2 (padded)


def _vmem():
    return pl.BlockSpec(memory_space=pltpu.MemorySpace.VMEM)


# ---------------------------------------------------------------------------
# Fused kernel: FeaturePerturber + bidirectional LSTM (last timestep) + FC head
# ---------------------------------------------------------------------------
def attacker_kernel(feat_ref, pert_ref,              # (B*S, I) each
                    wih_ref,                         # (I, 8H): both directions fused
                    wslab_ref,                       # (3H+F, LANE): W_hh_f | W1_f | W1_b | W2
                    bslab_ref,                       # (8, 8H): LSTM bias | b1 | b2 (padded)
                    pert_out_ref,                    # (B*S, I)
                    logits_ref):                     # (B, LANE)
    # 1) FeaturePerturber (fused): perturbed = feature + perturbation.
    px = feat_ref[...] + pert_ref[...]               # (B*S, I)
    pert_out_ref[...] = px

    # 2) Hoisted input projections for BOTH LSTM directions: one MXU push, one bias
    #    broadcast, outside the serial recurrence.
    gx = (jnp.dot(px, wih_ref[...], preferred_element_type=jnp.float32)
          + bslab_ref[0:1, :])                       # (B*S, 8H)
    # (B*S, 8H) -> (B, S, 8H): splits the 16 rows at the 8-sublane tile boundary (free).
    gx = gx.reshape(B, S, 8 * H)

    whh_f = wslab_ref[_OFF_WHH:_OFF_WHH + H, 0:4 * H]          # (H, 4H)

    # Gate nonlinearity on the full (B, 4H) 128-lane vreg with ONE EUP call:
    # PyTorch gate order is (i, f, g, o); i/f/o use sigmoid, g uses tanh, and
    # tanh(x) == 2*sigmoid(2x) - 1, so a lane mask folds everything into one sigmoid.
    lane = lax.broadcasted_iota(jnp.int32, (B, 4 * H), 1)
    is_g = jnp.logical_and(lane >= 2 * H, lane < 3 * H)
    g_scale = jnp.where(is_g, 2.0, 1.0)              # loop-invariant, hoisted
    g_bias = jnp.where(is_g, -1.0, 0.0)              # loop-invariant, hoisted

    def activate(pre):
        z = jax.nn.sigmoid(pre * g_scale)            # single EUP push over the gate vreg
        act = z * g_scale + g_bias                   # 2*sig(2x)-1 on g lanes, identity else
        return (act[:, 0:H], act[:, H:2 * H], act[:, 2 * H:3 * H], act[:, 3 * H:4 * H])

    # 3) Forward recurrence, fully unrolled (S is small and static); only h @ W_hh_f and the
    #    gate math remain on the serial path.
    h = jnp.zeros((B, H), jnp.float32)
    c = jnp.zeros((B, H), jnp.float32)
    for t in range(S):
        pre = gx[:, t, 0:4 * H] + jnp.dot(h, whh_f, preferred_element_type=jnp.float32)
        i_g, f_g, g_g, o_g = activate(pre)
        c = f_g * c + i_g * g_g
        h = o_g * jnp.tanh(c)

    # 4) Backward direction: only h_bwd at t = S-1 is consumed by the head and it is the
    #    backward pass's FIRST step (zero initial h and c), so a single cell with no
    #    recurrent term suffices (h0 @ W_hh_b == 0, f*c0 == 0).  Numerically identical.
    i_b, _f_b, g_b, o_b = activate(gx[:, S - 1, 4 * H:8 * H])
    h_bwd = o_b * jnp.tanh(i_b * g_b)

    # 5) Head: ReLU(concat(hf, hb)) @ W1 == ReLU(hf) @ W1[:H] + ReLU(hb) @ W1[H:]
    hf = jnp.maximum(h, 0.0)
    hb = jnp.maximum(h_bwd, 0.0)
    w1_f = wslab_ref[_OFF_W1F:_OFF_W1F + H, 0:F]
    w1_b = wslab_ref[_OFF_W1B:_OFF_W1B + H, 0:F]
    b1 = bslab_ref[1:2, 0:F]
    z1 = (jnp.dot(hf, w1_f, preferred_element_type=jnp.float32)
          + jnp.dot(hb, w1_b, preferred_element_type=jnp.float32)
          + b1)
    z1 = jnp.maximum(z1, 0.0)
    # Lane-dense (B, LANE) write; real logits live in columns [0, C).
    w2 = wslab_ref[_OFF_W2:_OFF_W2 + F, 0:LANE]
    b2 = bslab_ref[2:3, 0:LANE]
    logits_ref[...] = jnp.dot(z1, w2, preferred_element_type=jnp.float32) + b2


# ---------------------------------------------------------------------------
# Wrapper
# ---------------------------------------------------------------------------
def prepare_kernel_params(p):
    """One-time repacking of the raw parameters into the fused-kernel slab layout."""
    wih_cat = jnp.concatenate([p["wih_f"], p["wih_b"]], axis=1)        # (I, 8H)

    wslab = jnp.zeros((_WSLAB_ROWS, LANE), jnp.float32)
    wslab = wslab.at[_OFF_WHH:_OFF_WHH + H, 0:4 * H].set(p["whh_f"])
    wslab = wslab.at[_OFF_W1F:_OFF_W1F + 2 * H, 0:F].set(p["w1"])      # W1_f then W1_b rows
    wslab = wslab.at[_OFF_W2:_OFF_W2 + F, 0:C].set(p["w2"])

    bslab = jnp.zeros((_BSLAB_ROWS, 8 * H), jnp.float32)
    bslab = bslab.at[0:1, :].set(jnp.concatenate([p["b_f"], p["b_b"]], axis=1))
    bslab = bslab.at[1, 0:F].set(p["b1"][0])
    bslab = bslab.at[2, 0:C].set(p["b2"][0])

    return dict(perturbation=p["perturbation"], wih_cat=wih_cat, wslab=wslab, bslab=bslab)


def adversarial_attacker_forward(feature, kp):
    b, s, i = feature.shape
    feat2d = feature.reshape(b * s, i)                 # free contiguous reshape
    pert2d = kp["perturbation"].reshape(b * s, i)

    pert2d_out, logits_pad = pl.pallas_call(
        attacker_kernel,
        out_shape=(jax.ShapeDtypeStruct((b * s, i), jnp.float32),
                   jax.ShapeDtypeStruct((b, LANE), jnp.float32)),
        in_specs=[_vmem()] * 5,
        out_specs=(_vmem(), _vmem()),
    )(feat2d, pert2d, kp["wih_cat"], kp["wslab"], kp["bslab"])

    perturbed = pert2d_out.reshape(b, s, i)            # free contiguous reshape
    logits = logits_pad[:, :C]
    return perturbed, logits


# ---------------------------------------------------------------------------
# Deterministic synthetic parameters (no checkpoint loading).
# ---------------------------------------------------------------------------
def init_params(key):
    ks = jax.random.split(key, 11)
    k_lstm = 1.0 / np.sqrt(H)
    k_fc1 = 1.0 / np.sqrt(2 * H)
    k_fc2 = 1.0 / np.sqrt(F)

    def u(k, shape, scale):
        return jax.random.uniform(k, shape, jnp.float32, -scale, scale)

    return dict(
        # FeaturePerturber param (learnable; nonzero so the test is nontrivial)
        perturbation=0.1 * jax.random.normal(ks[0], (B, S, I), jnp.float32),
        # LSTM weights stored transposed vs. PyTorch ((in, 4H) instead of (4H, in)),
        # gate order i,f,g,o preserved; bias = b_ih + b_hh fused.
        wih_f=u(ks[1], (I, 4 * H), k_lstm),
        whh_f=u(ks[2], (H, 4 * H), k_lstm),
        b_f=u(ks[3], (1, 4 * H), k_lstm),
        wih_b=u(ks[4], (I, 4 * H), k_lstm),
        whh_b=u(ks[5], (H, 4 * H), k_lstm),   # kept for the reference; dead work in kernel
        b_b=u(ks[6], (1, 4 * H), k_lstm),
        w1=u(ks[7], (2 * H, F), k_fc1),
        b1=u(ks[8], (1, F), k_fc1),
        w2=u(ks[9], (F, C), k_fc2),
        b2=u(ks[10], (1, C), k_fc2),
    )


# ---------------------------------------------------------------------------
# Pure-JAX reference (full bidirectional LSTM; for correctness check only)
# ---------------------------------------------------------------------------
def reference_forward(feature, p):
    perturbed = feature + p["perturbation"]
    xs = jnp.transpose(perturbed, (1, 0, 2))  # (S, B, I)

    def run(wih, whh, b, seq):
        def step(carry, x_t):
            h, c = carry
            gates = x_t @ wih + h @ whh + b[0]
            i = jax.nn.sigmoid(gates[:, :H])
            f = jax.nn.sigmoid(gates[:, H:2 * H])
            g = jnp.tanh(gates[:, 2 * H:3 * H])
            o = jax.nn.sigmoid(gates[:, 3 * H:])
            c = f * c + i * g
            h = o * jnp.tanh(c)
            return (h, c), h
        init = (jnp.zeros((feature.shape[0], H), jnp.float32),
                jnp.zeros((feature.shape[0], H), jnp.float32))
        _, hs = lax.scan(step, init, seq)
        return hs

    hf = run(p["wih_f"], p["whh_f"], p["b_f"], xs)               # (S, B, H)
    hb = run(p["wih_b"], p["whh_b"], p["b_b"], xs[::-1])[::-1]   # (S, B, H)
    last = jnp.concatenate([hf[-1], hb[-1]], axis=-1)            # (B, 2H)
    a = jnp.maximum(last, 0.0)
    z1 = jnp.maximum(a @ p["w1"] + p["b1"], 0.0)
    logits = z1 @ p["w2"] + p["b2"]
    return perturbed, logits


if __name__ == "__main__":
    key = jax.random.PRNGKey(0)
    k_feat, k_par = jax.random.split(key)
    feature = jax.random.normal(k_feat, (B, S, I), jnp.float32)
    params = init_params(k_par)
    kparams = prepare_kernel_params(params)

    perturbed, logits = adversarial_attacker_forward(feature, kparams)
    jax.block_until_ready((perturbed, logits))

    ref_pert, ref_logits = reference_forward(feature, params)
    assert np.allclose(np.asarray(perturbed), np.asarray(ref_pert), atol=1e-5), "perturbed mismatch"
    assert np.allclose(np.asarray(logits), np.asarray(ref_logits), atol=1e-4, rtol=1e-4), "logits mismatch"

    print("KERNEL_OK")
</pallas_src>

<mosaic_0001>
module attributes {stable_mosaic.version = 11 : i64} {
  func.func @attacker_kernel(%arg0: memref<16x16xf32, #tpu.memory_space<vmem>>, %arg1: memref<16x16xf32, #tpu.memory_space<vmem>>, %arg2: memref<16x256xf32, #tpu.memory_space<vmem>>, %arg3: memref<128x128xf32, #tpu.memory_space<vmem>>, %arg4: memref<8x256xf32, #tpu.memory_space<vmem>>, %arg5: memref<16x16xf32, #tpu.memory_space<vmem>>, %arg6: memref<2x128xf32, #tpu.memory_space<vmem>>) attributes {dimension_semantics = [], scalar_prefetch = 0 : i64, scratch_operands = 0 : i64, tpu.core_type = #tpu.core_type<tc>} {
    %c0 = arith.constant 0 : index
    %c0_0 = arith.constant 0 : index
    %0 = vector.load %arg0[%c0, %c0_0] : memref<16x16xf32, #tpu.memory_space<vmem>>, vector<16x16xf32>
    %c0_1 = arith.constant 0 : index
    %c0_2 = arith.constant 0 : index
    %1 = vector.load %arg1[%c0_1, %c0_2] : memref<16x16xf32, #tpu.memory_space<vmem>>, vector<16x16xf32>
    %2 = arith.addf %0, %1 : vector<16x16xf32>
    %c0_3 = arith.constant 0 : index
    %c0_4 = arith.constant 0 : index
    %3 = vector.load %arg5[%c0_3, %c0_4] : memref<16x16xf32, #tpu.memory_space<vmem>>, vector<16x16xf32>
    tpu.vector_store %arg5[%c0_3, %c0_4], %2 {strides = array<i32>} : memref<16x16xf32, #tpu.memory_space<vmem>>, vector<16x16xf32>,
    %c0_5 = arith.constant 0 : index
    %c0_6 = arith.constant 0 : index
    %4 = vector.load %arg2[%c0_5, %c0_6] : memref<16x256xf32, #tpu.memory_space<vmem>>, vector<16x256xf32>
    %cst = arith.constant dense<0.000000e+00> : vector<16x256xf32>
    %5 = tpu.matmul %2, %4, %cst {dimension_numbers = #tpu.dot_dimension_numbers<[1], [0], [0], [1], [0, 0, 1, 1], [], []>} : vector<16x16xf32>, vector<16x256xf32>, vector<16x256xf32> -> vector<16x256xf32>
    %c0_7 = arith.constant 0 : index
    %c0_8 = arith.constant 0 : index
    %6 = vector.load %arg4[%c0_7, %c0_8] : memref<8x256xf32, #tpu.memory_space<vmem>>, vector<1x256xf32>
    %7 = vector.broadcast %6 : vector<1x256xf32> to vector<16x256xf32>
    %8 = arith.addf %5, %7 : vector<16x256xf32>
    %9 = vector.shape_cast %8 : vector<16x256xf32> to vector<2x8x256xf32>
    %c0_9 = arith.constant 0 : index
    %c0_10 = arith.constant 0 : index
    %10 = vector.load %arg3[%c0_9, %c0_10] : memref<128x128xf32, #tpu.memory_space<vmem>>, vector<32x128xf32>
    %11 = tpu.iota {dimensions = array<i32: 1>} : vector<2x128xi32>
    %c64_i32 = arith.constant 64 : i32
    %12 = vector.broadcast %c64_i32 : i32 to vector<2x128xi32>
    %13 = arith.cmpi sge, %11, %12 : vector<2x128xi32>
    %c96_i32 = arith.constant 96 : i32
    %14 = vector.broadcast %c96_i32 : i32 to vector<2x128xi32>
    %15 = arith.cmpi slt, %11, %14 : vector<2x128xi32>
    %16 = arith.andi %13, %15 : vector<2x128xi1>
    %cst_11 = arith.constant 2.000000e+00 : f32
    %cst_12 = arith.constant 1.000000e+00 : f32
    %17 = vector.broadcast %cst_11 : f32 to vector<2x128xf32>
    %18 = vector.broadcast %cst_12 : f32 to vector<2x128xf32>
    %19 = arith.select %16, %17, %18 : vector<2x128xi1>, vector<2x128xf32>
    %cst_13 = arith.constant -1.000000e+00 : f32
    %cst_14 = arith.constant 0.000000e+00 : f32
    %20 = vector.broadcast %cst_13 : f32 to vector<2x128xf32>
    %21 = vector.broadcast %cst_14 : f32 to vector<2x128xf32>
    %22 = arith.select %16, %20, %21 : vector<2x128xi1>, vector<2x128xf32>
    %cst_15 = arith.constant 0.000000e+00 : f32
    %23 = vector.broadcast %cst_15 : f32 to vector<2x32xf32>
    %cst_16 = arith.constant 0.000000e+00 : f32
    %24 = vector.broadcast %cst_16 : f32 to vector<2x32xf32>
    %25 = vector.extract_strided_slice %9 {offsets = [0, 0, 0], sizes = [2, 1, 128], strides = [1, 1, 1]} : vector<2x8x256xf32> to vector<2x1x128xf32>
    %26 = vector.shape_cast %25 : vector<2x1x128xf32> to vector<2x128xf32>
    %cst_17 = arith.constant dense<0.000000e+00> : vector<2x128xf32>
    %27 = tpu.matmul %23, %10, %cst_17 {dimension_numbers = #tpu.dot_dimension_numbers<[1], [0], [0], [1], [0, 0, 1, 1], [], []>} : vector<2x32xf32>, vector<32x128xf32>, vector<2x128xf32> -> vector<2x128xf32>
    %28 = arith.addf %26, %27 : vector<2x128xf32>
    %29 = arith.mulf %28, %19 : vector<2x128xf32>
    %30 = arith.negf %29 : vector<2x128xf32>
    %31 = math.exp %30 : vector<2x128xf32>
    %cst_18 = arith.constant 1.000000e+00 : f32
    %32 = vector.broadcast %cst_18 : f32 to vector<2x128xf32>
    %33 = arith.addf %32, %31 : vector<2x128xf32>
    %34 = arith.divf %32, %33 : vector<2x128xf32>
    %35 = arith.mulf %34, %19 : vector<2x128xf32>
    %36 = arith.addf %35, %22 : vector<2x128xf32>
    %37 = vector.extract_strided_slice %36 {offsets = [0, 0], sizes = [2, 32], strides = [1, 1]} : vector<2x128xf32> to vector<2x32xf32>
    %38 = vector.extract_strided_slice %36 {offsets = [0, 32], sizes = [2, 32], strides = [1, 1]} : vector<2x128xf32> to vector<2x32xf32>
    %39 = vector.extract_strided_slice %36 {offsets = [0, 64], sizes = [2, 32], strides = [1, 1]} : vector<2x128xf32> to vector<2x32xf32>
    %40 = vector.extract_strided_slice %36 {offsets = [0, 96], sizes = [2, 32], strides = [1, 1]} : vector<2x128xf32> to vector<2x32xf32>
    %41 = arith.mulf %38, %24 : vector<2x32xf32>
    %42 = arith.mulf %37, %39 : vector<2x32xf32>
    %43 = arith.addf %41, %42 : vector<2x32xf32>
    %44 = math.tanh %43 : vector<2x32xf32>
    %45 = arith.mulf %40, %44 : vector<2x32xf32>
    %46 = vector.extract_strided_slice %9 {offsets = [0, 1, 0], sizes = [2, 1, 128], strides = [1, 1, 1]} : vector<2x8x256xf32> to vector<2x1x128xf32>
    %47 = vector.shape_cast %46 : vector<2x1x128xf32> to vector<2x128xf32>
    %cst_19 = arith.constant dense<0.000000e+00> : vector<2x128xf32>
    %48 = tpu.matmul %45, %10, %cst_19 {dimension_numbers = #tpu.dot_dimension_numbers<[1], [0], [0], [1], [0, 0, 1, 1], [], []>} : vector<2x32xf32>, vector<32x128xf32>, vector<2x128xf32> -> vector<2x128xf32>
    %49 = arith.addf %47, %48 : vector<2x128xf32>
    %50 = arith.mulf %49, %19 : vector<2x128xf32>
    %51 = arith.negf %50 : vector<2x128xf32>
    %52 = math.exp %51 : vector<2x128xf32>
    %cst_20 = arith.constant 1.000000e+00 : f32
    %53 = vector.broadcast %cst_20 : f32 to vector<2x128xf32>
    %54 = arith.addf %53, %52 : vector<2x128xf32>
    %55 = arith.divf %53, %54 : vector<2x128xf32>
    %56 = arith.mulf %55, %19 : vector<2x128xf32>
    %57 = arith.addf %56, %22 : vector<2x128xf32>
    %58 = vector.extract_strided_slice %57 {offsets = [0, 0], sizes = [2, 32], strides = [1, 1]} : vector<2x128xf32> to vector<2x32xf32>
    %59 = vector.extract_strided_slice %57 {offsets = [0, 32], sizes = [2, 32], strides = [1, 1]} : vector<2x128xf32> to vector<2x32xf32>
    %60 = vector.extract_strided_slice %57 {offsets = [0, 64], sizes = [2, 32], strides = [1, 1]} : vector<2x128xf32> to vector<2x32xf32>
    %61 = vector.extract_strided_slice %57 {offsets = [0, 96], sizes = [2, 32], strides = [1, 1]} : vector<2x128xf32> to vector<2x32xf32>
    %62 = arith.mulf %59, %43 : vector<2x32xf32>
    %63 = arith.mulf %58, %60 : vector<2x32xf32>
    %64 = arith.addf %62, %63 : vector<2x32xf32>
    %65 = math.tanh %64 : vector<2x32xf32>
    %66 = arith.mulf %61, %65 : vector<2x32xf32>
    %67 = vector.extract_strided_slice %9 {offsets = [0, 2, 0], sizes = [2, 1, 128], strides = [1, 1, 1]} : vector<2x8x256xf32> to vector<2x1x128xf32>
    %68 = vector.shape_cast %67 : vector<2x1x128xf32> to vector<2x128xf32>
    %cst_21 = arith.constant dense<0.000000e+00> : vector<2x128xf32>
    %69 = tpu.matmul %66, %10, %cst_21 {dimension_numbers = #tpu.dot_dimension_numbers<[1], [0], [0], [1], [0, 0, 1, 1], [], []>} : vector<2x32xf32>, vector<32x128xf32>, vector<2x128xf32> -> vector<2x128xf32>
    %70 = arith.addf %68, %69 : vector<2x128xf32>
    %71 = arith.mulf %70, %19 : vector<2x128xf32>
    %72 = arith.negf %71 : vector<2x128xf32>
    %73 = math.exp %72 : vector<2x128xf32>
    %cst_22 = arith.constant 1.000000e+00 : f32
    %74 = vector.broadcast %cst_22 : f32 to vector<2x128xf32>
    %75 = arith.addf %74, %73 : vector<2x128xf32>
    %76 = arith.divf %74, %75 : vector<2x128xf32>
    %77 = arith.mulf %76, %19 : vector<2x128xf32>
    %78 = arith.addf %77, %22 : vector<2x128xf32>
    %79 = vector.extract_strided_slice %78 {offsets = [0, 0], sizes = [2, 32], strides = [1, 1]} : vector<2x128xf32> to vector<2x32xf32>
    %80 = vector.extract_strided_slice %78 {offsets = [0, 32], sizes = [2, 32], strides = [1, 1]} : vector<2x128xf32> to vector<2x32xf32>
    %81 = vector.extract_strided_slice %78 {offsets = [0, 64], sizes = [2, 32], strides = [1, 1]} : vector<2x128xf32> to vector<2x32xf32>
    %82 = vector.extract_strided_slice %78 {offsets = [0, 96], sizes = [2, 32], strides = [1, 1]} : vector<2x128xf32> to vector<2x32xf32>
    %83 = arith.mulf %80, %64 : vector<2x32xf32>
    %84 = arith.mulf %79, %81 : vector<2x32xf32>
    %85 = arith.addf %83, %84 : vector<2x32xf32>
    %86 = math.tanh %85 : vector<2x32xf32>
    %87 = arith.mulf %82, %86 : vector<2x32xf32>
    %88 = vector.extract_strided_slice %9 {offsets = [0, 3, 0], sizes = [2, 1, 128], strides = [1, 1, 1]} : vector<2x8x256xf32> to vector<2x1x128xf32>
    %89 = vector.shape_cast %88 : vector<2x1x128xf32> to vector<2x128xf32>
    %cst_23 = arith.constant dense<0.000000e+00> : vector<2x128xf32>
    %90 = tpu.matmul %87, %10, %cst_23 {dimension_numbers = #tpu.dot_dimension_numbers<[1], [0], [0], [1], [0, 0, 1, 1], [], []>} : vector<2x32xf32>, vector<32x128xf32>, vector<2x128xf32> -> vector<2x128xf32>
    %91 = arith.addf %89, %90 : vector<2x128xf32>
    %92 = arith.mulf %91, %19 : vector<2x128xf32>
    %93 = arith.negf %92 : vector<2x128xf32>
    %94 = math.exp %93 : vector<2x128xf32>
    %cst_24 = arith.constant 1.000000e+00 : f32
    %95 = vector.broadcast %cst_24 : f32 to vector<2x128xf32>
    %96 = arith.addf %95, %94 : vector<2x128xf32>
    %97 = arith.divf %95, %96 : vector<2x128xf32>
    %98 = arith.mulf %97, %19 : vector<2x128xf32>
    %99 = arith.addf %98, %22 : vector<2x128xf32>
    %100 = vector.extract_strided_slice %99 {offsets = [0, 0], sizes = [2, 32], strides = [1, 1]} : vector<2x128xf32> to vector<2x32xf32>
    %101 = vector.extract_strided_slice %99 {offsets = [0, 32], sizes = [2, 32], strides = [1, 1]} : vector<2x128xf32> to vector<2x32xf32>
    %102 = vector.extract_strided_slice %99 {offsets = [0, 64], sizes = [2, 32], strides = [1, 1]} : vector<2x128xf32> to vector<2x32xf32>
    %103 = vector.extract_strided_slice %99 {offsets = [0, 96], sizes = [2, 32], strides = [1, 1]} : vector<2x128xf32> to vector<2x32xf32>
    %104 = arith.mulf %101, %85 : vector<2x32xf32>
    %105 = arith.mulf %100, %102 : vector<2x32xf32>
    %106 = arith.addf %104, %105 : vector<2x32xf32>
    %107 = math.tanh %106 : vector<2x32xf32>
    %108 = arith.mulf %103, %107 : vector<2x32xf32>
    %109 = vector.extract_strided_slice %9 {offsets = [0, 4, 0], sizes = [2, 1, 128], strides = [1, 1, 1]} : vector<2x8x256xf32> to vector<2x1x128xf32>
    %110 = vector.shape_cast %109 : vector<2x1x128xf32> to vector<2x128xf32>
    %cst_25 = arith.constant dense<0.000000e+00> : vector<2x128xf32>
    %111 = tpu.matmul %108, %10, %cst_25 {dimension_numbers = #tpu.dot_dimension_numbers<[1], [0], [0], [1], [0, 0, 1, 1], [], []>} : vector<2x32xf32>, vector<32x128xf32>, vector<2x128xf32> -> vector<2x128xf32>
    %112 = arith.addf %110, %111 : vector<2x128xf32>
    %113 = arith.mulf %112, %19 : vector<2x128xf32>
    %114 = arith.negf %113 : vector<2x128xf32>
    %115 = math.exp %114 : vector<2x128xf32>
    %cst_26 = arith.constant 1.000000e+00 : f32
    %116 = vector.broadcast %cst_26 : f32 to vector<2x128xf32>
    %117 = arith.addf %116, %115 : vector<2x128xf32>
    %118 = arith.divf %116, %117 : vector<2x128xf32>
    %119 = arith.mulf %118, %19 : vector<2x128xf32>
    %120 = arith.addf %119, %22 : vector<2x128xf32>
    %121 = vector.extract_strided_slice %120 {offsets = [0, 0], sizes = [2, 32], strides = [1, 1]} : vector<2x128xf32> to vector<2x32xf32>
    %122 = vector.extract_strided_slice %120 {offsets = [0, 32], sizes = [2, 32], strides = [1, 1]} : vector<2x128xf32> to vector<2x32xf32>
    %123 = vector.extract_strided_slice %120 {offsets = [0, 64], sizes = [2, 32], strides = [1, 1]} : vector<2x128xf32> to vector<2x32xf32>
    %124 = vector.extract_strided_slice %120 {offsets = [0, 96], sizes = [2, 32], strides = [1, 1]} : vector<2x128xf32> to vector<2x32xf32>
    %125 = arith.mulf %122, %106 : vector<2x32xf32>
    %126 = arith.mulf %121, %123 : vector<2x32xf32>
    %127 = arith.addf %125, %126 : vector<2x32xf32>
    %128 = math.tanh %127 : vector<2x32xf32>
    %129 = arith.mulf %124, %128 : vector<2x32xf32>
    %130 = vector.extract_strided_slice %9 {offsets = [0, 5, 0], sizes = [2, 1, 128], strides = [1, 1, 1]} : vector<2x8x256xf32> to vector<2x1x128xf32>
    %131 = vector.shape_cast %130 : vector<2x1x128xf32> to vector<2x128xf32>
    %cst_27 = arith.constant dense<0.000000e+00> : vector<2x128xf32>
    %132 = tpu.matmul %129, %10, %cst_27 {dimension_numbers = #tpu.dot_dimension_numbers<[1], [0], [0], [1], [0, 0, 1, 1], [], []>} : vector<2x32xf32>, vector<32x128xf32>, vector<2x128xf32> -> vector<2x128xf32>
    %133 = arith.addf %131, %132 : vector<2x128xf32>
    %134 = arith.mulf %133, %19 : vector<2x128xf32>
    %135 = arith.negf %134 : vector<2x128xf32>
    %136 = math.exp %135 : vector<2x128xf32>
    %cst_28 = arith.constant 1.000000e+00 : f32
    %137 = vector.broadcast %cst_28 : f32 to vector<2x128xf32>
    %138 = arith.addf %137, %136 : vector<2x128xf32>
    %139 = arith.divf %137, %138 : vector<2x128xf32>
    %140 = arith.mulf %139, %19 : vector<2x128xf32>
    %141 = arith.addf %140, %22 : vector<2x128xf32>
    %142 = vector.extract_strided_slice %141 {offsets = [0, 0], sizes = [2, 32], strides = [1, 1]} : vector<2x128xf32> to vector<2x32xf32>
    %143 = vector.extract_strided_slice %141 {offsets = [0, 32], sizes = [2, 32], strides = [1, 1]} : vector<2x128xf32> to vector<2x32xf32>
    %144 = vector.extract_strided_slice %141 {offsets = [0, 64], sizes = [2, 32], strides = [1, 1]} : vector<2x128xf32> to vector<2x32xf32>
    %145 = vector.extract_strided_slice %141 {offsets = [0, 96], sizes = [2, 32], strides = [1, 1]} : vector<2x128xf32> to vector<2x32xf32>
    %146 = arith.mulf %143, %127 : vector<2x32xf32>
    %147 = arith.mulf %142, %144 : vector<2x32xf32>
    %148 = arith.addf %146, %147 : vector<2x32xf32>
    %149 = math.tanh %148 : vector<2x32xf32>
    %150 = arith.mulf %145, %149 : vector<2x32xf32>
    %151 = vector.extract_strided_slice %9 {offsets = [0, 6, 0], sizes = [2, 1, 128], strides = [1, 1, 1]} : vector<2x8x256xf32> to vector<2x1x128xf32>
    %152 = vector.shape_cast %151 : vector<2x1x128xf32> to vector<2x128xf32>
    %cst_29 = arith.constant dense<0.000000e+00> : vector<2x128xf32>
    %153 = tpu.matmul %150, %10, %cst_29 {dimension_numbers = #tpu.dot_dimension_numbers<[1], [0], [0], [1], [0, 0, 1, 1], [], []>} : vector<2x32xf32>, vector<32x128xf32>, vector<2x128xf32> -> vector<2x128xf32>
    %154 = arith.addf %152, %153 : vector<2x128xf32>
    %155 = arith.mulf %154, %19 : vector<2x128xf32>
    %156 = arith.negf %155 : vector<2x128xf32>
    %157 = math.exp %156 : vector<2x128xf32>
    %cst_30 = arith.constant 1.000000e+00 : f32
    %158 = vector.broadcast %cst_30 : f32 to vector<2x128xf32>
    %159 = arith.addf %158, %157 : vector<2x128xf32>
    %160 = arith.divf %158, %159 : vector<2x128xf32>
    %161 = arith.mulf %160, %19 : vector<2x128xf32>
    %162 = arith.addf %161, %22 : vector<2x128xf32>
    %163 = vector.extract_strided_slice %162 {offsets = [0, 0], sizes = [2, 32], strides = [1, 1]} : vector<2x128xf32> to vector<2x32xf32>
    %164 = vector.extract_strided_slice %162 {offsets = [0, 32], sizes = [2, 32], strides = [1, 1]} : vector<2x128xf32> to vector<2x32xf32>
    %165 = vector.extract_strided_slice %162 {offsets = [0, 64], sizes = [2, 32], strides = [1, 1]} : vector<2x128xf32> to vector<2x32xf32>
    %166 = vector.extract_strided_slice %162 {offsets = [0, 96], sizes = [2, 32], strides = [1, 1]} : vector<2x128xf32> to vector<2x32xf32>
    %167 = arith.mulf %164, %148 : vector<2x32xf32>
    %168 = arith.mulf %163, %165 : vector<2x32xf32>
    %169 = arith.addf %167, %168 : vector<2x32xf32>
    %170 = math.tanh %169 : vector<2x32xf32>
    %171 = arith.mulf %166, %170 : vector<2x32xf32>
    %172 = vector.extract_strided_slice %9 {offsets = [0, 7, 0], sizes = [2, 1, 128], strides = [1, 1, 1]} : vector<2x8x256xf32> to vector<2x1x128xf32>
    %173 = vector.shape_cast %172 : vector<2x1x128xf32> to vector<2x128xf32>
    %cst_31 = arith.constant dense<0.000000e+00> : vector<2x128xf32>
    %174 = tpu.matmul %171, %10, %cst_31 {dimension_numbers = #tpu.dot_dimension_numbers<[1], [0], [0], [1], [0, 0, 1, 1], [], []>} : vector<2x32xf32>, vector<32x128xf32>, vector<2x128xf32> -> vector<2x128xf32>
    %175 = arith.addf %173, %174 : vector<2x128xf32>
    %176 = arith.mulf %175, %19 : vector<2x128xf32>
    %177 = arith.negf %176 : vector<2x128xf32>
    %178 = math.exp %177 : vector<2x128xf32>
    %cst_32 = arith.constant 1.000000e+00 : f32
    %179 = vector.broadcast %cst_32 : f32 to vector<2x128xf32>
    %180 = arith.addf %179, %178 : vector<2x128xf32>
    %181 = arith.divf %179, %180 : vector<2x128xf32>
    %182 = arith.mulf %181, %19 : vector<2x128xf32>
    %183 = arith.addf %182, %22 : vector<2x128xf32>
    %184 = vector.extract_strided_slice %183 {offsets = [0, 0], sizes = [2, 32], strides = [1, 1]} : vector<2x128xf32> to vector<2x32xf32>
    %185 = vector.extract_strided_slice %183 {offsets = [0, 32], sizes = [2, 32], strides = [1, 1]} : vector<2x128xf32> to vector<2x32xf32>
    %186 = vector.extract_strided_slice %183 {offsets = [0, 64], sizes = [2, 32], strides = [1, 1]} : vector<2x128xf32> to vector<2x32xf32>
    %187 = vector.extract_strided_slice %183 {offsets = [0, 96], sizes = [2, 32], strides = [1, 1]} : vector<2x128xf32> to vector<2x32xf32>
    %188 = arith.mulf %185, %169 : vector<2x32xf32>
    %189 = arith.mulf %184, %186 : vector<2x32xf32>
    %190 = arith.addf %188, %189 : vector<2x32xf32>
    %191 = math.tanh %190 : vector<2x32xf32>
    %192 = arith.mulf %187, %191 : vector<2x32xf32>
    %193 = vector.extract_strided_slice %9 {offsets = [0, 7, 128], sizes = [2, 1, 128], strides = [1, 1, 1]} : vector<2x8x256xf32> to vector<2x1x128xf32>
    %194 = vector.shape_cast %193 : vector<2x1x128xf32> to vector<2x128xf32>
    %195 = arith.mulf %194, %19 : vector<2x128xf32>
    %196 = arith.negf %195 : vector<2x128xf32>
    %197 = math.exp %196 : vector<2x128xf32>
    %cst_33 = arith.constant 1.000000e+00 : f32
    %198 = vector.broadcast %cst_33 : f32 to vector<2x128xf32>
    %199 = arith.addf %198, %197 : vector<2x128xf32>
    %200 = arith.divf %198, %199 : vector<2x128xf32>
    %201 = arith.mulf %200, %19 : vector<2x128xf32>
    %202 = arith.addf %201, %22 : vector<2x128xf32>
    %203 = vector.extract_strided_slice %202 {offsets = [0, 0], sizes = [2, 32], strides = [1, 1]} : vector<2x128xf32> to vector<2x32xf32>
    %204 = vector.extract_strided_slice %202 {offsets = [0, 64], sizes = [2, 32], strides = [1, 1]} : vector<2x128xf32> to vector<2x32xf32>
    %205 = vector.extract_strided_slice %202 {offsets = [0, 96], sizes = [2, 32], strides = [1, 1]} : vector<2x128xf32> to vector<2x32xf32>
    %206 = arith.mulf %203, %204 : vector<2x32xf32>
    %207 = math.tanh %206 : vector<2x32xf32>
    %208 = arith.mulf %205, %207 : vector<2x32xf32>
    %cst_34 = arith.constant 0.000000e+00 : f32
    %209 = vector.broadcast %cst_34 : f32 to vector<2x32xf32>
    %210 = arith.maximumf %192, %209 : vector<2x32xf32>
    %cst_35 = arith.constant 0.000000e+00 : f32
    %211 = vector.broadcast %cst_35 : f32 to vector<2x32xf32>
    %212 = arith.maximumf %208, %211 : vector<2x32xf32>
    %c32 = arith.constant 32 : index
    %c0_36 = arith.constant 0 : index
    %213 = vector.load %arg3[%c32, %c0_36] : memref<128x128xf32, #tpu.memory_space<vmem>>, vector<32x32xf32>
    %c64 = arith.constant 64 : index
    %c0_37 = arith.constant 0 : index
    %214 = vector.load %arg3[%c64, %c0_37] : memref<128x128xf32, #tpu.memory_space<vmem>>, vector<32x32xf32>
    %c1 = arith.constant 1 : index
    %c0_38 = arith.constant 0 : index
    %215 = vector.load %arg4[%c1, %c0_38] : memref<8x256xf32, #tpu.memory_space<vmem>>, vector<1x32xf32>
    %cst_39 = arith.constant dense<0.000000e+00> : vector<2x32xf32>
    %216 = tpu.matmul %210, %213, %cst_39 {dimension_numbers = #tpu.dot_dimension_numbers<[1], [0], [0], [1], [0, 0, 1, 1], [], []>} : vector<2x32xf32>, vector<32x32xf32>, vector<2x32xf32> -> vector<2x32xf32>
    %cst_40 = arith.constant dense<0.000000e+00> : vector<2x32xf32>
    %217 = tpu.matmul %212, %214, %cst_40 {dimension_numbers = #tpu.dot_dimension_numbers<[1], [0], [0], [1], [0, 0, 1, 1], [], []>} : vector<2x32xf32>, vector<32x32xf32>, vector<2x32xf32> -> vector<2x32xf32>
    %218 = arith.addf %216, %217 : vector<2x32xf32>
    %219 = vector.broadcast %215 : vector<1x32xf32> to vector<2x32xf32>
    %220 = arith.addf %218, %219 : vector<2x32xf32>
    %cst_41 = arith.constant 0.000000e+00 : f32
    %221 = vector.broadcast %cst_41 : f32 to vector<2x32xf32>
    %222 = arith.maximumf %220, %221 : vector<2x32xf32>
    %c96 = arith.constant 96 : index
    %c0_42 = arith.constant 0 : index
    %223 = vector.load %arg3[%c96, %c0_42] : memref<128x128xf32, #tpu.memory_space<vmem>>, vector<32x128xf32>
    %c2 = arith.constant 2 : index
    %c0_43 = arith.constant 0 : index
    %224 = vector.load %arg4[%c2, %c0_43] : memref<8x256xf32, #tpu.memory_space<vmem>>, vector<1x128xf32>
    %cst_44 = arith.constant dense<0.000000e+00> : vector<2x128xf32>
    %225 = tpu.matmul %222, %223, %cst_44 {dimension_numbers = #tpu.dot_dimension_numbers<[1], [0], [0], [1], [0, 0, 1, 1], [], []>} : vector<2x32xf32>, vector<32x128xf32>, vector<2x128xf32> -> vector<2x128xf32>
    %226 = vector.broadcast %224 : vector<1x128xf32> to vector<2x128xf32>
    %227 = arith.addf %225, %226 : vector<2x128xf32>
    %c0_45 = arith.constant 0 : index
    %c0_46 = arith.constant 0 : index
    %228 = vector.load %arg6[%c0_45, %c0_46] : memref<2x128xf32, #tpu.memory_space<vmem>>, vector<2x128xf32>
    tpu.vector_store %arg6[%c0_45, %c0_46], %227 {strides = array<i32>} : memref<2x128xf32, #tpu.memory_space<vmem>>, vector<2x128xf32>,
    return
  }
}

</mosaic_0001>

<bundles_post_ra>
// kernel: tpu_custom_call.1
= control target key start
LH: loop header
LB: loop body
LE: loop exit
PB: predicated region body
PF: predicated region fallthrough
CT: control target
= control target key end

     0   :  { %12 = vsyncpa [#allocation3], 0  ;;  %s2066_s0 = inlined_call_operand.hbm [shape: f32[16,16], index: 0, kind: input, shape index: {}]   ;;  %s2067_s1 = inlined_call_operand.hbm [shape: f32[16,16], index: 1, kind: input, shape index: {}]   ;;  %s2068_s2 = inlined_call_operand.hbm [shape: f32[16,256], index: 2, kind: input, shape index: {}]   ;;  %s2069_s3 = inlined_call_operand.hbm [shape: f32[128,128], index: 3, kind: input, shape index: {}]   ;;  %s2070_s4 = inlined_call_operand.hbm [shape: f32[8,256], index: 4, kind: input, shape index: {}]   ;;  %s2071_s5 = inlined_call_operand.hbm [shape: f32[16,16], index: 5, kind: output, shape index: {0}]   ;;  %s2072_s6 = inlined_call_operand.hbm [shape: f32[2,128], index: 6, kind: output, shape index: {1}]  }
   0x1   :  { %13 = vsyncpa [#allocation6], 0 }
   0x2   :  { %14 = vsyncpa [#allocation9], 0 }
   0x3   :  { %15 = vsyncpa [#allocation4], 0 }
   0x4   :  { %16 = vsyncpa [#allocation13], 0  ;;  %s34_s23 = sshll.u32 %s2067_s1, 4  ;;  %s1668_s24 = smov [#allocation5]   ;;  %s35_s23 = int_to_ptr.hbm [resolvable:$true] %s34_s23 }
   0x5   :  { %s36_s25 = sshll.u32 %s1668_s24, 4  ;;  %s60_s28 = sshll.u32 %s2069_s3, 4  ;;  %s37_s25 = int_to_ptr.vmem [resolvable:$true] %s36_s25  ;;  %s61_s28 = int_to_ptr.hbm [resolvable:$true] %s60_s28 }
   0x6   :  { %s1669_s29 = smov 128   ;;  %s1670_s30 = smov 8  }
   0x7   :  { %42 = dma.hbm_to_vmem [thread:$0]  %s35_s23, 256, %s37_s25, [#allocation6], %s1669_s29, %s1669_s29, %s1670_s30  }
   0x8   :  { %s1671_s7 = smov [#allocation8]   ;;  %s21_s1 = sshll.u32 %s2066_s0, 4  ;;  %s22_s1 = int_to_ptr.hbm [resolvable:$true] %s21_s1 }
   0x9   :  { %s62_s8 = sshll.u32 %s1671_s7, 4  ;;  %s47_s12 = sshll.u32 %s2068_s2, 4  ;;  %s63_s8 = int_to_ptr.vmem [resolvable:$true] %s62_s8  ;;  %s48_s12 = int_to_ptr.hbm [resolvable:$true] %s47_s12 }
   0xa   :  { %68 = dma.hbm_to_vmem [thread:$0]  %s61_s28, 2048, %s63_s8, [#allocation9], %s1669_s29, %s1669_s29, %s1670_s30  }
   0xb   :  { %s1672_s13 = smov [#allocation2]   ;;  %s1673_s15 = smov [#allocation7]  }
   0xc   :  { %s23_s14 = sshll.u32 %s1672_s13, 4  ;;  %s49_s0 = sshll.u32 %s1673_s15, 4  ;;  %s24_s14 = int_to_ptr.vmem [resolvable:$true] %s23_s14  ;;  %s50_s0 = int_to_ptr.vmem [resolvable:$true] %s49_s0 }
   0xd   :  { %29 = dma.hbm_to_vmem [thread:$0]  %s22_s1, 256, %s24_s14, [#allocation3], %s1669_s29, %s1669_s29, %s1670_s30  }
   0xe   :  { %s1674_s16 = smov 256   ;;  %s1675_s17 = smov 16  }
   0xf   :  { %55 = dma.hbm_to_vmem [thread:$0]  %s48_s12, 512, %s50_s0, [#allocation6], %s1674_s16, %s1674_s16, %s1675_s17  }
  0x10   :  { %s74_s20 = sshll.u32 %s2070_s4, 4  ;;  %s1676_s2 = smov [#allocation10]   ;;  %s75_s20 = int_to_ptr.hbm [resolvable:$true] %s74_s20 }
  0x11   :  { %s76_s21 = sshll.u32 %s1676_s2, 4  ;;  %s77_s21 = int_to_ptr.vmem [resolvable:$true] %s76_s21 }
  0x12   :  { %79 = dma.hbm_to_vmem [thread:$0]  %s75_s20, 256, %s77_s21, [#allocation9]  }
  0x13   :  { %1658 = dma.done.wait [#allocation3], 256  }
  0x14   :  { %1659 = vsyncadd [#allocation3], 4294967040 }
  0x15   :  { %1660 = dma.done.wait [#allocation6], 768  }
  0x16   :  { %1661 = vsyncadd [#allocation6], 4294966528 }
  0x17   :  { %1662 = dma.done.wait [#allocation9], 2304  }
  0x18   :  { %1663 = vsyncadd [#allocation9], 4294964992  ;;  %v1743_v0 = vld [vmem:[#allocation8 + $0x18] sm:$0xff]  ;;  %v111_v1 = vld [vmem:[#allocation7 + $0x10] sm:$0xff]  ;;  %vm106_vm0 = vcmask 130048   ;;  %v1677_v12 = vmov 0.0   ;;  %v175_v13 = vlaneseq }
  0x19   :  { %v1745_v2 = vld [vmem:[#allocation8 + $0x10] sm:$0xff]  ;;  %198 = vmatpush.msra.mxu2 %v1743_v0  ;;  %139 = vmatpush.msra.mxu0 %v111_v1  ;;  %v109_v3 = vld [vmem:[#allocation7] sm:$0xff]  ;;  %v1748_v5 = vld [vmem:[#allocation8 + $0x8] sm:$0xff]  ;;  %v1678_v21 = vmov 1.0   ;;  %s1679_s4 = smov 64   ;;  %s1680_s22 = smov 32  }
  0x1a   :  { %v100_v4 = vld [vmem:[#allocation2] sm:$0xff]  ;;  %v102_v6 = vld [vmem:[#allocation5] sm:$0xff]  ;;  %v101_v7 = vld [vmem:[#allocation2 + $0x8] sm:$0xff]  ;;  %311 = vmatpush.msra.mxu3 %v1743_v0  ;;  %v176_v14 = vand.u32 127, %v175_v13  ;;  %vm293_vm12 = vcmask 1041409   ;;  %vm182_vm13 = vcmask 261120  }
  0x1b   :  { %199 = vmatpush.msra.mxu2 %v1745_v2  ;;  %140 = vmatpush.msra.mxu0 %v109_v3  ;;  %v1752_v8 = vadd.f32 %v102_v6, %v100_v4  ;;  %v103_v9 = vld [vmem:[#allocation5 + $0x8] sm:$0xff]  ;;  %v1754_v10 = vld [vmem:[#allocation8] sm:$0xff]  ;;  %s1681_s23 = smov 96   ;;  %s1682_s24 = smov [#allocation11]  }
  0x1c   :  { %v1756_v11 = vadd.f32 %v103_v9, %v101_v7  ;;  %312 = vmatpush.msra.mxu3 %v1745_v2  ;;  %v113_v16 = vld [vmem:[#allocation10] ss:$8 sm:$0x3]  ;;  %vm177_vm1 = vcmp.ge.s32.totalorder %v176_v14, 64  ;;  %vm178_vm2 = vcmp.lt.s32.totalorder %v176_v14, 96  ;;  %s1300_s25 = sshll.u32 %s1682_s24, 4  ;;  %s1301_s25 = int_to_ptr.vmem [resolvable:$true] %s1300_s25 }
  0x1d   :  { %669 = vmatpush.msrb.mxu0 %v1743_v0  ;;  %200 = vmatpush.msra.mxu2 %v1748_v5  ;;  %107 = vst.msk [vmem:[#allocation11] sm:$0xff] %vm106_vm0, %v1752_v8  ;;  %v115_v17 = vperm.slane %v113_v16, 0  ;;  %vm1788_vm3 = vmand %vm177_vm1, %vm178_vm2  ;;  %s1302_s28 = sshll.u32 %s2071_s5, 4  ;;  %s1683_s7 = smov [#allocation12]   ;;  %s1303_s28 = int_to_ptr.hbm [resolvable:$true] %s1302_s28 }
  0x1e   :  { %1333 = vmatmul.msk.f32.vlgmr.msra.gmra.mxu0 %vm106_vm0, %v1752_v8  ;;  %108 = vst.msk [vmem:[#allocation11 + $0x8] sm:$0xff] %vm106_vm0, %v1756_v11  ;;  %313 = vmatpush.msra.mxu3 %v1748_v5  ;;  %v1796_v22 = vsel %vm1788_vm3, 2.0, %v1678_v21  ;;  %v1808_v55 = vsel %vm1788_vm3, -1.0, %v1677_v12  ;;  %s1314_s8 = sshll.u32 %s1683_s7, 4  ;;  %s1316_s1 = sshll.u32 %s2072_s6, 4  ;;  %s1315_s8 = int_to_ptr.vmem [resolvable:$true] %s1314_s8  ;;  %s1317_s1 = int_to_ptr.hbm [resolvable:$true] %s1316_s1 }
  0x1f   :  { %670 = vmatpush.msrb.mxu0 %v1745_v2  ;;  %201 = vmatpush.msra.mxu2 %v1754_v10  ;;  %1308 = dma.vmem_to_hbm [thread:$0]  %s1301_s25, 256, %s1303_s28, [#allocation4], %s1669_s29, %s1669_s29, %s1670_s30  }
  0x20   :  { %202 = vmatmul.f32.vlgmr.msra.gmra.mxu2 %v1677_v12  ;;  %314 = vmatpush.msra.mxu3 %v1754_v10 }
  0x21   :  { %429 = vmatpush.msrb.mxu2 %v1743_v0  ;;  %671 = vmatpush.msrb.mxu0 %v1748_v5 }
  0x22   :  { %549 = vmatpush.msrb.mxu3 %v1743_v0 }
  0x23   :  { %430 = vmatpush.msrb.mxu2 %v1745_v2  ;;  %672 = vmatpush.msrb.mxu0 %v1754_v10 }
  0x24   :  { %550 = vmatpush.msrb.mxu3 %v1745_v2 }
  0x25   :  { %431 = vmatpush.msrb.mxu2 %v1748_v5 }
  0x26   :  { %1334 = vmatmul.msk.f32.gmra.mxu0 %vm106_vm0, %v1756_v11  ;;  %551 = vmatpush.msrb.mxu3 %v1748_v5 }
  0x27   :  { %432 = vmatpush.msrb.mxu2 %v1754_v10 }
  0x28   :  { %552 = vmatpush.msrb.mxu3 %v1754_v10 }
  0x29   :  { %909 = vmatpush.msra.mxu2 %v1743_v0 }
  0x2b   :  { %910 = vmatpush.msra.mxu2 %v1745_v2 }
  0x2d   :  { %911 = vmatpush.msra.mxu2 %v1748_v5 }
  0x2f   :  { %912 = vmatpush.msra.mxu2 %v1754_v10 }
  0x9b   :  { %v142_v15 = vpop.f32.mrf.mxu0 }
  0x9c   :  { %v1792_v19 = vadd.f32 %v142_v15, %v115_v17 }
  0xa3   :  { %v145_v20 = vpop.f32.mrf.mxu0  ;;  %v203_v24 = vpop.f32.mrf.mxu2 }
  0xa4   :  { %v1798_v23 = vadd.f32 %v145_v20, %v115_v17  ;;  %v207_v25 = vrot.slane %v203_v24, 1  ;;  %v210_v26 = vadd.f32 %v203_v24, %v1792_v19 }
  0xa6   :  { %v211_v27 = vadd.f32 %v207_v25, %v1798_v23  ;;  %v212_v28 = vmul.f32 %v210_v26, %v1796_v22 }
  0xa8   :  { %v213_v29 = vmul.f32 %v211_v27, %v1796_v22  ;;  %v1337_v30 = vmul.f32 -1.442695, %v212_v28 }
  0xaa   :  { %1381 = vpow2.f32 %v1337_v30  ;;  %v1338_v31 = vmul.f32 -1.442695, %v213_v29 }
  0xac   :  { %1383 = vpow2.f32 %v1338_v31 }
  0xb0   :  { %v1382_v32 = vpop.eup %1381 }
  0xb1   :  { %v220_v33 = vadd.f32 1.0, %v1382_v32 }
  0xb2   :  { %v1384_v34 = vpop.eup %1383 }
  0xb3   :  { %v221_v35 = vadd.f32 1.0, %v1384_v34  ;;  %1385 = vrcp.f32 %v220_v33  ;;  %v233_v49 = vand.u32 2147483648, %v220_v33  ;;  %vm227_vm9 = vweird.f32 %v220_v33 }
  0xb4   :  { %v231_v51 = vand.u32 2147483647, %v220_v33 }
  0xb5   :  { %1387 = vrcp.f32 %v221_v35  ;;  %v248_v43 = vand.u32 2147483648, %v221_v35  ;;  %v246_v45 = vand.u32 2147483647, %v221_v35  ;;  %vm242_vm5 = vweird.f32 %v221_v35 }
  0xb6   :  { %v234_v56 = vor.u32 1.1754944e-38, %v233_v49  ;;  %vm232_vm11 = vcmp.eq.f32.partialorder %v231_v51, 8.507059e+37 }
  0xb7   :  { %v249_v48 = vor.u32 1.1754944e-38, %v248_v43  ;;  %vm247_vm8 = vcmp.eq.f32.partialorder %v246_v45, 8.507059e+37 }
  0xb9   :  { %v1386_v36 = vpop.eup %1385 }
  0xba   :  { %v223_v37 = vmul.f32 %v1386_v36, %v220_v33  ;;  %vm228_vm6 = vweird.f32 %v1386_v36 }
  0xbb   :  { %v1388_v38 = vpop.eup %1387  ;;  %vm229_vm10 = vmor %vm227_vm9, %vm228_vm6 }
  0xbc   :  { %v224_v39 = vsub.f32 1.0, %v223_v37  ;;  %v238_v40 = vmul.f32 %v1388_v38, %v221_v35  ;;  %vm243_vm4 = vweird.f32 %v1388_v38 }
  0xbd   :  { %vm244_vm7 = vmor %vm242_vm5, %vm243_vm4 }
  0xbe   :  { %v239_v41 = vsub.f32 1.0, %v238_v40  ;;  %v225_v42 = vmul.f32 %v1386_v36, %v224_v39 }
  0xc0   :  { %v240_v44 = vmul.f32 %v1388_v38, %v239_v41  ;;  %v226_v47 = vadd.f32 %v1386_v36, %v225_v42 }
  0xc2   :  { %v241_v46 = vadd.f32 %v1388_v38, %v240_v44  ;;  %v230_v54 = vsel %vm229_vm10, %v1386_v36, %v226_v47 }
  0xc3   :  { %v235_v58 = vsel %vm232_vm11, %v234_v56, %v230_v54 }
  0xc4   :  { %v245_v50 = vsel %vm244_vm7, %v1388_v38, %v241_v46  ;;  %v252_v59 = vmul.f32 %v235_v58, %v1796_v22 }
  0xc5   :  { %v250_v52 = vsel %vm247_vm8, %v249_v48, %v245_v50 }
  0xc6   :  { %v253_v53 = vmul.f32 %v250_v52, %v1796_v22  ;;  %v254_v60 = vadd.f32 %v252_v59, %v1808_v55 }
  0xc8   :  { %v255_v57 = vadd.f32 %v253_v53, %v1808_v55  ;;  %v256_v7 = vmul.f32 0.0, %v254_v60 }
  0xca   :  { %262 = vrot.lane.b32.xlu0 %v255_v57, %s1679_s4  ;;  %v257_v3 = vmul.f32 0.0, %v255_v57 }
  0xd2   :  { %260 = vrot.lane.b32.xlu0 %v254_v60, %s1679_s4 }
 0x13c   :  { %v263_v61 = vpop.permute.xlu0 %262 }
 0x13d   :  { %v267_v62 = vmul.f32 %v263_v61, %v255_v57 }
 0x13f   :  { %272 = vrot.lane.b32.xlu1 %v267_v62, %s1680_s22 }
 0x144   :  { %v261_v63 = vpop.permute.xlu0 %260 }
 0x145   :  { %v266_v1 = vmul.f32 %v261_v63, %v254_v60 }
 0x147   :  { %270 = vrot.lane.b32.xlu1 %v266_v1, %s1680_s22 }
 0x1b1   :  { %v273_v4 = vpop.permute.xlu1 %272 }
 0x1b2   :  { %v1817_v6 = vadd.f32 %v273_v4, %v257_v3 }
 0x1b4   :  { %1389 = vtanh.f32 %v1817_v6  ;;  %v372_v4 = vrot.slane %v1817_v6, 7 }
 0x1b9   :  { %v271_v9 = vpop.permute.xlu1 %270 }
 0x1ba   :  { %v1390_v12 = vpop.eup %1389  ;;  %v1820_v13 = vadd.f32 %v271_v9, %v256_v7 }
 0x1bb   :  { %284 = vrot.lane.b32.xlu2 %v1390_v12, %s1679_s4 }
 0x1bc   :  { %1391 = vtanh.f32 %v1820_v13 }
 0x1c2   :  { %v1392_v14 = vpop.eup %1391 }
 0x1c3   :  { %282 = vrot.lane.b32.xlu2 %v1392_v14, %s1679_s4 }
 0x215   :  { %v285_v15 = vpop.permute.xlu2 %284 }
 0x216   :  { %v289_v16 = vmul.f32 %v285_v15, %v255_v57  ;;  %v371_v15 = vrot.slane %v1820_v13, 7 }
 0x218   :  { %v292_v18 = vrot.slane %v289_v16, 7 }
 0x21d   :  { %v283_v17 = vpop.permute.xlu2 %282 }
 0x21e   :  { %v288_v20 = vmul.f32 %v283_v17, %v254_v60 }
 0x220   :  { %v294_v21 = vsel %vm293_vm12, %v292_v18, %v288_v20 }
 0x221   :  { %295 = vrot.lane.b32.xlu0 %v294_v21, %s1680_s22 }
 0x293   :  { %v296_v24 = vpop.permute.xlu0 %295 }
 0x294   :  { %1339 = vmatmul.msk.f32.vlgmr.msra.gmra.mxu3 %vm182_vm13, %v296_v24 }
 0x295   :  { %1029 = vmatpush.msra.mxu3 %v1743_v0 }
 0x297   :  { %1030 = vmatpush.msra.mxu3 %v1745_v2 }
 0x299   :  { %1031 = vmatpush.msra.mxu3 %v1748_v5 }
 0x29b   :  { %1032 = vmatpush.msra.mxu3 %v1754_v10 }
 0x317   :  { %v316_v25 = vpop.f32.mrf.mxu3 }
 0x318   :  { %v320_v26 = vrot.slane %v316_v25, 7  ;;  %v324_v27 = vadd.f32 %v316_v25, %v1798_v23 }
 0x31a   :  { %v323_v28 = vadd.f32 %v320_v26, %v1792_v19  ;;  %v326_v29 = vmul.f32 %v324_v27, %v1796_v22 }
 0x31c   :  { %v325_v30 = vmul.f32 %v323_v28, %v1796_v22  ;;  %v1341_v31 = vmul.f32 -1.442695, %v326_v29 }
 0x31e   :  { %v1340_v32 = vmul.f32 -1.442695, %v325_v30  ;;  %1393 = vpow2.f32 %v1341_v31 }
 0x320   :  { %1395 = vpow2.f32 %v1340_v32 }
 0x324   :  { %v1394_v33 = vpop.eup %1393 }
 0x325   :  { %v334_v34 = vadd.f32 1.0, %v1394_v33 }
 0x326   :  { %v1396_v35 = vpop.eup %1395 }
 0x327   :  { %v333_v36 = vadd.f32 1.0, %v1396_v35  ;;  %1397 = vrcp.f32 %v334_v34  ;;  %v361_v42 = vand.u32 2147483648, %v334_v34  ;;  %v359_v44 = vand.u32 2147483647, %v334_v34 }
 0x328   :  { %vm355_vm15 = vweird.f32 %v334_v34 }
 0x329   :  { %1399 = vrcp.f32 %v333_v36  ;;  %v346_v46 = vand.u32 2147483648, %v333_v36  ;;  %v344_v49 = vand.u32 2147483647, %v333_v36  ;;  %v362_v50 = vor.u32 1.1754944e-38, %v361_v42 }
 0x32a   :  { %vm360_vm3 = vcmp.eq.f32.partialorder %v359_v44, 8.507059e+37  ;;  %vm340_vm4 = vweird.f32 %v333_v36 }
 0x32b   :  { %v347_v54 = vor.u32 1.1754944e-38, %v346_v46  ;;  %vm345_vm6 = vcmp.eq.f32.partialorder %v344_v49, 8.507059e+37 }
 0x32d   :  { %v1398_v37 = vpop.eup %1397 }
 0x32e   :  { %v351_v38 = vmul.f32 %v1398_v37, %v334_v34  ;;  %vm356_vm14 = vweird.f32 %v1398_v37 }
 0x32f   :  { %v1400_v39 = vpop.eup %1399  ;;  %vm357_vm2 = vmor %vm355_vm15, %vm356_vm14 }
 0x330   :  { %v336_v40 = vmul.f32 %v1400_v39, %v333_v36  ;;  %v352_v41 = vsub.f32 1.0, %v351_v38  ;;  %vm341_vm1 = vweird.f32 %v1400_v39 }
 0x331   :  { %vm342_vm5 = vmor %vm340_vm4, %vm341_vm1 }
 0x332   :  { %v353_v43 = vmul.f32 %v1398_v37, %v352_v41  ;;  %v337_v45 = vsub.f32 1.0, %v336_v40 }
 0x334   :  { %v354_v47 = vadd.f32 %v1398_v37, %v353_v43  ;;  %v338_v48 = vmul.f32 %v1400_v39, %v337_v45 }
 0x336   :  { %v358_v51 = vsel %vm357_vm2, %v1398_v37, %v354_v47  ;;  %v339_v52 = vadd.f32 %v1400_v39, %v338_v48 }
 0x337   :  { %v363_v53 = vsel %vm360_vm3, %v362_v50, %v358_v51 }
 0x338   :  { %v366_v56 = vmul.f32 %v363_v53, %v1796_v22  ;;  %v343_v57 = vsel %vm342_vm5, %v1400_v39, %v339_v52 }
 0x339   :  { %v348_v58 = vsel %vm345_vm6, %v347_v54, %v343_v57 }
 0x33a   :  { %v368_v59 = vadd.f32 %v366_v56, %v1808_v55  ;;  %v365_v60 = vmul.f32 %v348_v58, %v1796_v22 }
 0x33c   :  { %381 = vrot.lane.b32.xlu2 %v368_v59, %s1679_s4  ;;  %v367_v61 = vadd.f32 %v365_v60, %v1808_v55  ;;  %v376_v7 = vmul.f32 %v372_v4, %v368_v59 }
 0x33e   :  { %379 = vrot.lane.b32.xlu1 %v367_v61, %s1679_s4  ;;  %v375_v16 = vmul.f32 %v371_v15, %v367_v61 }
 0x396   :  { %v382_v62 = vpop.permute.xlu2 %381 }
 0x397   :  { %v386_v63 = vmul.f32 %v382_v62, %v368_v59 }
 0x399   :  { %391 = vrot.lane.b32.xlu1 %v386_v63, %s1680_s22 }
 0x3b0   :  { %v380_v1 = vpop.permute.xlu1 %379 }
 0x3b1   :  { %v385_v3 = vmul.f32 %v380_v1, %v367_v61 }
 0x3b3   :  { %389 = vrot.lane.b32.xlu0 %v385_v3, %s1680_s22 }
 0x40b   :  { %v392_v9 = vpop.permute.xlu1 %391 }
 0x40c   :  { %v1845_v12 = vadd.f32 %v392_v9, %v376_v7 }
 0x40e   :  { %1401 = vtanh.f32 %v1845_v12 }
 0x414   :  { %v1402_v14 = vpop.eup %1401 }
 0x415   :  { %403 = vrot.lane.b32.xlu0 %v1402_v14, %s1679_s4 }
 0x425   :  { %v390_v17 = vpop.permute.xlu0 %389 }
 0x426   :  { %v1850_v18 = vadd.f32 %v390_v17, %v375_v16  ;;  %v491_v16 = vrot.slane %v1845_v12, 7 }
 0x428   :  { %1403 = vtanh.f32 %v1850_v18  ;;  %v490_v15 = vrot.slane %v1850_v18, 7 }
 0x42e   :  { %v1404_v20 = vpop.eup %1403 }
 0x42f   :  { %401 = vrot.lane.b32.xlu2 %v1404_v20, %s1679_s4 }
 0x487   :  { %v404_v6 = vpop.permute.xlu0 %403 }
 0x488   :  { %v408_v25 = vmul.f32 %v404_v6, %v368_v59 }
 0x489   :  { %v402_v21 = vpop.permute.xlu2 %401 }
 0x48a   :  { %v407_v24 = vmul.f32 %v402_v21, %v367_v61 }
 0x48c   :  { %v411_v26 = vrot.slane %v407_v24, 1 }
 0x48e   :  { %v412_v27 = vsel %vm293_vm12, %v408_v25, %v411_v26 }
 0x48f   :  { %413 = vrot.lane.b32.xlu1 %v412_v27, %s1680_s22 }
 0x501   :  { %v414_v28 = vpop.permute.xlu1 %413 }
 0x502   :  { %1342 = vmatmul.msk.f32.vlgmr.msrb.gmra.mxu2 %vm182_vm13, %v414_v28 }
 0x585   :  { %v434_v13 = vpop.f32.mrf.mxu2 }
 0x586   :  { %v438_v29 = vrot.slane %v434_v13, 6  ;;  %v439_v30 = vrot.slane %v434_v13, 7 }
 0x588   :  { %v442_v31 = vadd.f32 %v438_v29, %v1792_v19  ;;  %v443_v32 = vadd.f32 %v439_v30, %v1798_v23 }
 0x58a   :  { %v444_v33 = vmul.f32 %v442_v31, %v1796_v22  ;;  %v445_v34 = vmul.f32 %v443_v32, %v1796_v22 }
 0x58c   :  { %v1343_v35 = vmul.f32 -1.442695, %v444_v33  ;;  %v1344_v36 = vmul.f32 -1.442695, %v445_v34 }
 0x58e   :  { %1405 = vpow2.f32 %v1343_v35 }
 0x58f   :  { %1407 = vpow2.f32 %v1344_v36 }
 0x594   :  { %v1406_v37 = vpop.eup %1405 }
 0x595   :  { %v1408_v38 = vpop.eup %1407  ;;  %v452_v39 = vadd.f32 1.0, %v1406_v37 }
 0x596   :  { %v453_v40 = vadd.f32 1.0, %v1408_v38 }
 0x597   :  { %1409 = vrcp.f32 %v452_v39  ;;  %v465_v47 = vand.u32 2147483648, %v452_v39  ;;  %v463_v50 = vand.u32 2147483647, %v452_v39  ;;  %vm459_vm9 = vweird.f32 %v452_v39 }
 0x598   :  { %1411 = vrcp.f32 %v453_v40  ;;  %v480_v48 = vand.u32 2147483648, %v453_v40  ;;  %v478_v52 = vand.u32 2147483647, %v453_v40  ;;  %vm474_vm10 = vweird.f32 %v453_v40 }
 0x599   :  { %v466_v56 = vor.u32 1.1754944e-38, %v465_v47  ;;  %vm464_vm15 = vcmp.eq.f32.partialorder %v463_v50, 8.507059e+37 }
 0x59a   :  { %v481_v57 = vor.u32 1.1754944e-38, %v480_v48  ;;  %vm479_vm1 = vcmp.eq.f32.partialorder %v478_v52, 8.507059e+37 }
 0x59d   :  { %v1410_v41 = vpop.eup %1409 }
 0x59e   :  { %v1412_v42 = vpop.eup %1411  ;;  %v455_v43 = vmul.f32 %v1410_v41, %v452_v39  ;;  %vm460_vm7 = vweird.f32 %v1410_v41 }
 0x59f   :  { %v470_v44 = vmul.f32 %v1412_v42, %v453_v40  ;;  %vm475_vm8 = vweird.f32 %v1412_v42  ;;  %vm461_vm11 = vmor %vm459_vm9, %vm460_vm7 }
 0x5a0   :  { %v456_v45 = vsub.f32 1.0, %v455_v43  ;;  %vm476_vm14 = vmor %vm474_vm10, %vm475_vm8 }
 0x5a1   :  { %v471_v46 = vsub.f32 1.0, %v470_v44 }
 0x5a2   :  { %v457_v49 = vmul.f32 %v1410_v41, %v456_v45 }
 0x5a3   :  { %v472_v51 = vmul.f32 %v1412_v42, %v471_v46 }
 0x5a4   :  { %v458_v53 = vadd.f32 %v1410_v41, %v457_v49 }
 0x5a5   :  { %v473_v54 = vadd.f32 %v1412_v42, %v472_v51 }
 0x5a6   :  { %v462_v58 = vsel %vm461_vm11, %v1410_v41, %v458_v53 }
 0x5a7   :  { %v477_v59 = vsel %vm476_vm14, %v1412_v42, %v473_v54  ;;  %v467_v60 = vsel %vm464_vm15, %v466_v56, %v462_v58 }
 0x5a8   :  { %v482_v61 = vsel %vm479_vm1, %v481_v57, %v477_v59  ;;  %v484_v62 = vmul.f32 %v467_v60, %v1796_v22 }
 0x5a9   :  { %v485_v63 = vmul.f32 %v482_v61, %v1796_v22 }
 0x5aa   :  { %v486_v1 = vadd.f32 %v484_v62, %v1808_v55 }
 0x5ab   :  { %v487_v3 = vadd.f32 %v485_v63, %v1808_v55 }
 0x5ac   :  { %498 = vrot.lane.b32.xlu2 %v486_v1, %s1679_s4  ;;  %v494_v17 = vmul.f32 %v490_v15, %v486_v1 }
 0x5ad   :  { %500 = vrot.lane.b32.xlu0 %v487_v3, %s1679_s4  ;;  %v495_v6 = vmul.f32 %v491_v16, %v487_v3 }
 0x606   :  { %v499_v4 = vpop.permute.xlu2 %498 }
 0x607   :  { %v504_v7 = vmul.f32 %v499_v4, %v486_v1 }
 0x609   :  { %508 = vrot.lane.b32.xlu1 %v504_v7, %s1680_s22 }
 0x61f   :  { %v501_v9 = vpop.permute.xlu0 %500 }
 0x620   :  { %v505_v14 = vmul.f32 %v501_v9, %v487_v3 }
 0x622   :  { %510 = vrot.lane.b32.xlu2 %v505_v14, %s1680_s22 }
 0x67b   :  { %v509_v20 = vpop.permute.xlu1 %508 }
 0x67c   :  { %v1871_v21 = vadd.f32 %v509_v20, %v494_v17  ;;  %v511_v24 = vpop.permute.xlu2 %510 }
 0x67d   :  { %v1873_v25 = vadd.f32 %v511_v24, %v495_v6 }
 0x67e   :  { %1413 = vtanh.f32 %v1871_v21  ;;  %v610_v24 = vrot.slane %v1871_v21, 7 }
 0x67f   :  { %1415 = vtanh.f32 %v1873_v25 }
 0x684   :  { %v1414_v26 = vpop.eup %1413 }
 0x685   :  { %v1416_v27 = vpop.eup %1415  ;;  %520 = vrot.lane.b32.xlu0 %v1414_v26, %s1679_s4 }
 0x686   :  { %522 = vrot.lane.b32.xlu1 %v1416_v27, %s1679_s4 }
 0x6f7   :  { %v521_v18 = vpop.permute.xlu0 %520 }
 0x6f8   :  { %v523_v12 = vpop.permute.xlu1 %522  ;;  %v526_v28 = vmul.f32 %v521_v18, %v486_v1 }
 0x6f9   :  { %v527_v13 = vmul.f32 %v523_v12, %v487_v3 }
 0x6fa   :  { %v530_v29 = vrot.slane %v526_v28, 2  ;;  %v611_v28 = vrot.slane %v1873_v25, 7 }
 0x6fb   :  { %v531_v30 = vrot.slane %v527_v13, 1 }
 0x6fd   :  { %v532_v31 = vsel %vm293_vm12, %v531_v30, %v530_v29 }
 0x6fe   :  { %533 = vrot.lane.b32.xlu2 %v532_v31, %s1680_s22 }
 0x758   :  { %v534_v32 = vpop.permute.xlu2 %533 }
 0x759   :  { %1345 = vmatmul.msk.f32.vlgmr.msrb.gmra.mxu3 %vm182_vm13, %v534_v32 }
 0x7dc   :  { %v554_v33 = vpop.f32.mrf.mxu3 }
 0x7dd   :  { %v558_v34 = vrot.slane %v554_v33, 5  ;;  %v559_v35 = vrot.slane %v554_v33, 6 }
 0x7df   :  { %v562_v36 = vadd.f32 %v558_v34, %v1792_v19  ;;  %v563_v37 = vadd.f32 %v559_v35, %v1798_v23 }
 0x7e1   :  { %v564_v38 = vmul.f32 %v562_v36, %v1796_v22  ;;  %v565_v39 = vmul.f32 %v563_v37, %v1796_v22 }
 0x7e3   :  { %v1346_v40 = vmul.f32 -1.442695, %v564_v38  ;;  %v1347_v41 = vmul.f32 -1.442695, %v565_v39 }
 0x7e5   :  { %1417 = vpow2.f32 %v1346_v40 }
 0x7e6   :  { %1419 = vpow2.f32 %v1347_v41 }
 0x7eb   :  { %v1418_v42 = vpop.eup %1417 }
 0x7ec   :  { %v1420_v43 = vpop.eup %1419  ;;  %v572_v44 = vadd.f32 1.0, %v1418_v42 }
 0x7ed   :  { %v573_v45 = vadd.f32 1.0, %v1420_v43 }
 0x7ee   :  { %1421 = vrcp.f32 %v572_v44  ;;  %v585_v52 = vand.u32 2147483648, %v572_v44  ;;  %v583_v56 = vand.u32 2147483647, %v572_v44  ;;  %vm579_vm4 = vweird.f32 %v572_v44 }
 0x7ef   :  { %1423 = vrcp.f32 %v573_v45  ;;  %v600_v53 = vand.u32 2147483648, %v573_v45  ;;  %v598_v58 = vand.u32 2147483647, %v573_v45  ;;  %vm594_vm5 = vweird.f32 %v573_v45 }
 0x7f0   :  { %v586_v61 = vor.u32 1.1754944e-38, %v585_v52  ;;  %vm584_vm8 = vcmp.eq.f32.partialorder %v583_v56, 8.507059e+37 }
 0x7f1   :  { %v601_v62 = vor.u32 1.1754944e-38, %v600_v53  ;;  %vm599_vm9 = vcmp.eq.f32.partialorder %v598_v58, 8.507059e+37 }
 0x7f4   :  { %v1422_v46 = vpop.eup %1421 }
 0x7f5   :  { %v1424_v47 = vpop.eup %1423  ;;  %v575_v48 = vmul.f32 %v1422_v46, %v572_v44  ;;  %vm580_vm2 = vweird.f32 %v1422_v46 }
 0x7f6   :  { %v590_v49 = vmul.f32 %v1424_v47, %v573_v45  ;;  %vm595_vm3 = vweird.f32 %v1424_v47  ;;  %vm581_vm6 = vmor %vm579_vm4, %vm580_vm2 }
 0x7f7   :  { %v576_v50 = vsub.f32 1.0, %v575_v48  ;;  %vm596_vm7 = vmor %vm594_vm5, %vm595_vm3 }
 0x7f8   :  { %v591_v51 = vsub.f32 1.0, %v590_v49 }
 0x7f9   :  { %v577_v54 = vmul.f32 %v1422_v46, %v576_v50 }
 0x7fa   :  { %v592_v57 = vmul.f32 %v1424_v47, %v591_v51 }
 0x7fb   :  { %v578_v59 = vadd.f32 %v1422_v46, %v577_v54 }
 0x7fc   :  { %v593_v60 = vadd.f32 %v1424_v47, %v592_v57 }
 0x7fd   :  { %v582_v63 = vsel %vm581_vm6, %v1422_v46, %v578_v59 }
 0x7fe   :  { %v597_v1 = vsel %vm596_vm7, %v1424_v47, %v593_v60  ;;  %v587_v3 = vsel %vm584_vm8, %v586_v61, %v582_v63 }
 0x7ff   :  { %v602_v4 = vsel %vm599_vm9, %v601_v62, %v597_v1  ;;  %v604_v7 = vmul.f32 %v587_v3, %v1796_v22 }
 0x800   :  { %v605_v9 = vmul.f32 %v602_v4, %v1796_v22 }
 0x801   :  { %v606_v14 = vadd.f32 %v604_v7, %v1808_v55 }
 0x802   :  { %v607_v15 = vadd.f32 %v605_v9, %v1808_v55 }
 0x803   :  { %618 = vrot.lane.b32.xlu0 %v606_v14, %s1679_s4  ;;  %v614_v26 = vmul.f32 %v610_v24, %v606_v14 }
 0x804   :  { %620 = vrot.lane.b32.xlu1 %v607_v15, %s1679_s4  ;;  %v615_v13 = vmul.f32 %v611_v28, %v607_v15 }
 0x875   :  { %v619_v16 = vpop.permute.xlu0 %618 }
 0x876   :  { %v621_v17 = vpop.permute.xlu1 %620  ;;  %v624_v20 = vmul.f32 %v619_v16, %v606_v14 }
 0x877   :  { %v625_v6 = vmul.f32 %v621_v17, %v607_v15 }
 0x878   :  { %628 = vrot.lane.b32.xlu2 %v624_v20, %s1680_s22 }
 0x879   :  { %630 = vrot.lane.b32.xlu0 %v625_v6, %s1680_s22 }
 0x8d2   :  { %v629_v27 = vpop.permute.xlu2 %628 }
 0x8d3   :  { %v1895_v18 = vadd.f32 %v629_v27, %v614_v26 }
 0x8d5   :  { %1425 = vtanh.f32 %v1895_v18 }
 0x8db   :  { %v1426_v12 = vpop.eup %1425 }
 0x8dc   :  { %640 = vrot.lane.b32.xlu1 %v1426_v12, %s1679_s4 }
 0x8eb   :  { %v631_v29 = vpop.permute.xlu0 %630 }
 0x8ec   :  { %v1900_v30 = vadd.f32 %v631_v29, %v615_v13 }
 0x8ee   :  { %1427 = vtanh.f32 %v1900_v30  ;;  %v731_v13 = vrot.slane %v1900_v30, 7  ;;  %v112_v30 = vld [vmem:[#allocation7 + $0x18] sm:$0xff] }
 0x8ef   :  { %162 = vmatpush.msra.mxu1 %v112_v30 }
 0x8f4   :  { %v1428_v31 = vpop.eup %1427 }
 0x8f5   :  { %642 = vrot.lane.b32.xlu2 %v1428_v31, %s1679_s4 }
 0x94e   :  { %v641_v21 = vpop.permute.xlu1 %640 }
 0x94f   :  { %v643_v32 = vpop.permute.xlu2 %642  ;;  %v646_v33 = vmul.f32 %v641_v21, %v606_v14 }
 0x950   :  { %v647_v34 = vmul.f32 %v643_v32, %v607_v15 }
 0x951   :  { %v650_v35 = vrot.slane %v646_v33, 3  ;;  %v730_v33 = vrot.slane %v1895_v18, 7 }
 0x952   :  { %v651_v36 = vrot.slane %v647_v34, 2 }
 0x954   :  { %v652_v37 = vsel %vm293_vm12, %v651_v36, %v650_v35 }
 0x955   :  { %653 = vrot.lane.b32.xlu0 %v652_v37, %s1680_s22 }
 0x9c7   :  { %v654_v25 = vpop.permute.xlu0 %653 }
 0x9c8   :  { %1348 = vmatmul.msk.f32.vlgmr.msrb.gmra.mxu0 %vm182_vm13, %v654_v25  ;;  %v110_v25 = vld [vmem:[#allocation7 + $0x8] sm:$0xff] }
 0x9c9   :  { %163 = vmatpush.msra.mxu1 %v110_v25 }
 0x9ca   :  { %1335 = vmatmul.msk.f32.vlgmr.msra.gmra.mxu1 %vm106_vm0, %v1752_v8 }
 0x9cb   :  { %789 = vmatpush.msrb.mxu1 %v1743_v0 }
 0x9cd   :  { %790 = vmatpush.msrb.mxu1 %v1745_v2 }
 0x9cf   :  { %791 = vmatpush.msrb.mxu1 %v1748_v5 }
 0x9d1   :  { %792 = vmatpush.msrb.mxu1 %v1754_v10 }
 0x9d2   :  { %1336 = vmatmul.msk.f32.gmra.mxu1 %vm106_vm0, %v1756_v11 }
 0xa45   :  { %v674_v38 = vpop.f32.mrf.mxu0 }
 0xa46   :  { %v678_v39 = vrot.slane %v674_v38, 4  ;;  %v679_v40 = vrot.slane %v674_v38, 5 }
 0xa47   :  { %v1940_v2 = vpop.f32.mrf.mxu1 }
 0xa48   :  { %v682_v41 = vadd.f32 %v678_v39, %v1792_v19  ;;  %v683_v42 = vadd.f32 %v679_v40, %v1798_v23 }
 0xa4a   :  { %v684_v43 = vmul.f32 %v682_v41, %v1796_v22  ;;  %v685_v44 = vmul.f32 %v683_v42, %v1796_v22 }
 0xa4c   :  { %v1349_v45 = vmul.f32 -1.442695, %v684_v43  ;;  %v1350_v46 = vmul.f32 -1.442695, %v685_v44 }
 0xa4e   :  { %1429 = vpow2.f32 %v1349_v45 }
 0xa4f   :  { %1431 = vpow2.f32 %v1350_v46  ;;  %v1942_v5 = vpop.f32.mrf.mxu1 }
 0xa54   :  { %v1430_v47 = vpop.eup %1429 }
 0xa55   :  { %v1432_v48 = vpop.eup %1431  ;;  %v692_v49 = vadd.f32 1.0, %v1430_v47 }
 0xa56   :  { %v693_v50 = vadd.f32 1.0, %v1432_v48 }
 0xa57   :  { %1433 = vrcp.f32 %v692_v49  ;;  %v705_v58 = vand.u32 2147483648, %v692_v49  ;;  %v703_v61 = vand.u32 2147483647, %v692_v49  ;;  %vm699_vm14 = vweird.f32 %v692_v49 }
 0xa58   :  { %1435 = vrcp.f32 %v693_v50  ;;  %v720_v59 = vand.u32 2147483648, %v693_v50  ;;  %v718_v63 = vand.u32 2147483647, %v693_v50  ;;  %vm714_vm15 = vweird.f32 %v693_v50 }
 0xa59   :  { %v706_v4 = vor.u32 1.1754944e-38, %v705_v58  ;;  %vm704_vm3 = vcmp.eq.f32.partialorder %v703_v61, 8.507059e+37 }
 0xa5a   :  { %v721_v7 = vor.u32 1.1754944e-38, %v720_v59  ;;  %vm719_vm4 = vcmp.eq.f32.partialorder %v718_v63, 8.507059e+37 }
 0xa5d   :  { %v1434_v51 = vpop.eup %1433 }
 0xa5e   :  { %v1436_v52 = vpop.eup %1435  ;;  %v695_v53 = vmul.f32 %v1434_v51, %v692_v49  ;;  %vm700_vm10 = vweird.f32 %v1434_v51 }
 0xa5f   :  { %v710_v54 = vmul.f32 %v1436_v52, %v693_v50  ;;  %vm715_vm11 = vweird.f32 %v1436_v52  ;;  %vm701_vm1 = vmor %vm699_vm14, %vm700_vm10 }
 0xa60   :  { %v696_v56 = vsub.f32 1.0, %v695_v53  ;;  %vm716_vm2 = vmor %vm714_vm15, %vm715_vm11 }
 0xa61   :  { %v711_v57 = vsub.f32 1.0, %v710_v54 }
 0xa62   :  { %v697_v60 = vmul.f32 %v1434_v51, %v696_v56 }
 0xa63   :  { %v712_v62 = vmul.f32 %v1436_v52, %v711_v57 }
 0xa64   :  { %v698_v1 = vadd.f32 %v1434_v51, %v697_v60 }
 0xa65   :  { %v713_v3 = vadd.f32 %v1436_v52, %v712_v62 }
 0xa66   :  { %v702_v9 = vsel %vm701_vm1, %v1434_v51, %v698_v1 }
 0xa67   :  { %v717_v14 = vsel %vm716_vm2, %v1436_v52, %v713_v3  ;;  %v707_v15 = vsel %vm704_vm3, %v706_v4, %v702_v9 }
 0xa68   :  { %v722_v16 = vsel %vm719_vm4, %v721_v7, %v717_v14  ;;  %v724_v17 = vmul.f32 %v707_v15, %v1796_v22 }
 0xa69   :  { %v725_v20 = vmul.f32 %v722_v16, %v1796_v22 }
 0xa6a   :  { %v726_v6 = vadd.f32 %v724_v17, %v1808_v55 }
 0xa6b   :  { %v727_v24 = vadd.f32 %v725_v20, %v1808_v55 }
 0xa6c   :  { %738 = vrot.lane.b32.xlu1 %v726_v6, %s1679_s4  ;;  %v734_v34 = vmul.f32 %v730_v33, %v726_v6 }
 0xa6d   :  { %740 = vrot.lane.b32.xlu2 %v727_v24, %s1679_s4  ;;  %v735_v29 = vmul.f32 %v731_v13, %v727_v24 }
 0xac7   :  { %v741_v26 = vpop.permute.xlu2 %740 }
 0xac8   :  { %v745_v27 = vmul.f32 %v741_v26, %v727_v24 }
 0xaca   :  { %750 = vrot.lane.b32.xlu1 %v745_v27, %s1680_s22 }
 0xade   :  { %v739_v12 = vpop.permute.xlu1 %738 }
 0xadf   :  { %v744_v28 = vmul.f32 %v739_v12, %v726_v6 }
 0xae1   :  { %748 = vrot.lane.b32.xlu0 %v744_v28, %s1680_s22 }
 0xb3c   :  { %v751_v31 = vpop.permute.xlu1 %750 }
 0xb3d   :  { %v1920_v21 = vadd.f32 %v751_v31, %v735_v29 }
 0xb3f   :  { %1437 = vtanh.f32 %v1920_v21  ;;  %v851_v33 = vrot.slane %v1920_v21, 7 }
 0xb45   :  { %v1438_v32 = vpop.eup %1437 }
 0xb46   :  { %762 = vrot.lane.b32.xlu0 %v1438_v32, %s1679_s4 }
 0xb53   :  { %v749_v35 = vpop.permute.xlu0 %748 }
 0xb54   :  { %v1925_v36 = vadd.f32 %v749_v35, %v734_v34 }
 0xb56   :  { %1439 = vtanh.f32 %v1925_v36  ;;  %v850_v32 = vrot.slane %v1925_v36, 7 }
 0xb5c   :  { %v1440_v37 = vpop.eup %1439 }
 0xb5d   :  { %760 = vrot.lane.b32.xlu2 %v1440_v37, %s1679_s4 }
 0xbb7   :  { %v761_v18 = vpop.permute.xlu2 %760 }
 0xbb8   :  { %v763_v38 = vpop.permute.xlu0 %762  ;;  %v766_v39 = vmul.f32 %v761_v18, %v726_v6 }
 0xbb9   :  { %v767_v40 = vmul.f32 %v763_v38, %v727_v24 }
 0xbba   :  { %v770_v41 = vrot.slane %v766_v39, 4 }
 0xbbb   :  { %v771_v42 = vrot.slane %v767_v40, 3 }
 0xbbd   :  { %v772_v43 = vsel %vm293_vm12, %v771_v42, %v770_v41 }
 0xbbe   :  { %773 = vrot.lane.b32.xlu1 %v772_v43, %s1680_s22 }
 0xc30   :  { %v774_v0 = vpop.permute.xlu1 %773 }
 0xc31   :  { %1351 = vmatmul.msk.f32.vlgmr.msrb.gmra.mxu1 %vm182_vm13, %v774_v0 }
 0xcae   :  { %v794_v8 = vpop.f32.mrf.mxu1 }
 0xcaf   :  { %v798_v10 = vrot.slane %v794_v8, 3  ;;  %v799_v11 = vrot.slane %v794_v8, 4 }
 0xcb1   :  { %v802_v44 = vadd.f32 %v798_v10, %v1792_v19  ;;  %v803_v45 = vadd.f32 %v799_v11, %v1798_v23 }
 0xcb3   :  { %v804_v46 = vmul.f32 %v802_v44, %v1796_v22  ;;  %v805_v47 = vmul.f32 %v803_v45, %v1796_v22 }
 0xcb5   :  { %v1352_v48 = vmul.f32 -1.442695, %v804_v46  ;;  %v1353_v49 = vmul.f32 -1.442695, %v805_v47 }
 0xcb7   :  { %1441 = vpow2.f32 %v1352_v48 }
 0xcb8   :  { %1443 = vpow2.f32 %v1353_v49 }
 0xcbd   :  { %v1442_v50 = vpop.eup %1441 }
 0xcbe   :  { %v1444_v51 = vpop.eup %1443  ;;  %v812_v52 = vadd.f32 1.0, %v1442_v50 }
 0xcbf   :  { %v813_v53 = vadd.f32 1.0, %v1444_v51 }
 0xcc0   :  { %1445 = vrcp.f32 %v812_v52  ;;  %v825_v61 = vand.u32 2147483648, %v812_v52  ;;  %v823_v1 = vand.u32 2147483647, %v812_v52  ;;  %vm819_vm6 = vweird.f32 %v812_v52 }
 0xcc1   :  { %1447 = vrcp.f32 %v813_v53  ;;  %v840_v62 = vand.u32 2147483648, %v813_v53  ;;  %v838_v4 = vand.u32 2147483647, %v813_v53  ;;  %vm834_vm7 = vweird.f32 %v813_v53 }
 0xcc2   :  { %v826_v14 = vor.u32 1.1754944e-38, %v825_v61  ;;  %vm824_vm10 = vcmp.eq.f32.partialorder %v823_v1, 8.507059e+37 }
 0xcc3   :  { %v841_v15 = vor.u32 1.1754944e-38, %v840_v62  ;;  %vm839_vm11 = vcmp.eq.f32.partialorder %v838_v4, 8.507059e+37 }
 0xcc6   :  { %v1446_v54 = vpop.eup %1445 }
 0xcc7   :  { %v1448_v56 = vpop.eup %1447  ;;  %v815_v57 = vmul.f32 %v1446_v54, %v812_v52  ;;  %vm820_vm0 = vweird.f32 %v1446_v54 }
 0xcc8   :  { %v830_v58 = vmul.f32 %v1448_v56, %v813_v53  ;;  %vm835_vm5 = vweird.f32 %v1448_v56  ;;  %vm821_vm8 = vmor %vm819_vm6, %vm820_vm0 }
 0xcc9   :  { %v816_v59 = vsub.f32 1.0, %v815_v57  ;;  %vm836_vm9 = vmor %vm834_vm7, %vm835_vm5 }
 0xcca   :  { %v831_v60 = vsub.f32 1.0, %v830_v58 }
 0xccb   :  { %v817_v63 = vmul.f32 %v1446_v54, %v816_v59 }
 0xccc   :  { %v832_v3 = vmul.f32 %v1448_v56, %v831_v60 }
 0xccd   :  { %v818_v7 = vadd.f32 %v1446_v54, %v817_v63 }
 0xcce   :  { %v833_v9 = vadd.f32 %v1448_v56, %v832_v3 }
 0xccf   :  { %v822_v16 = vsel %vm821_vm8, %v1446_v54, %v818_v7 }
 0xcd0   :  { %v837_v17 = vsel %vm836_vm9, %v1448_v56, %v833_v9  ;;  %v827_v20 = vsel %vm824_vm10, %v826_v14, %v822_v16 }
 0xcd1   :  { %v842_v6 = vsel %vm839_vm11, %v841_v15, %v837_v17  ;;  %v844_v24 = vmul.f32 %v827_v20, %v1796_v22 }
 0xcd2   :  { %v845_v26 = vmul.f32 %v842_v6, %v1796_v22 }
 0xcd3   :  { %v846_v27 = vadd.f32 %v844_v24, %v1808_v55 }
 0xcd4   :  { %v847_v12 = vadd.f32 %v845_v26, %v1808_v55 }
 0xcd5   :  { %858 = vrot.lane.b32.xlu2 %v846_v27, %s1679_s4  ;;  %v854_v34 = vmul.f32 %v850_v32, %v846_v27 }
 0xcd6   :  { %860 = vrot.lane.b32.xlu0 %v847_v12, %s1679_s4  ;;  %v855_v37 = vmul.f32 %v851_v33, %v847_v12 }
 0xd2f   :  { %v859_v28 = vpop.permute.xlu2 %858 }
 0xd30   :  { %v864_v13 = vmul.f32 %v859_v28, %v846_v27 }
 0xd32   :  { %868 = vrot.lane.b32.xlu1 %v864_v13, %s1680_s22 }
 0xd48   :  { %v861_v29 = vpop.permute.xlu0 %860 }
 0xd49   :  { %v865_v31 = vmul.f32 %v861_v29, %v847_v12 }
 0xd4b   :  { %870 = vrot.lane.b32.xlu2 %v865_v31, %s1680_s22 }
 0xda4   :  { %v869_v35 = vpop.permute.xlu1 %868 }
 0xda5   :  { %v1958_v30 = vadd.f32 %v869_v35, %v854_v34  ;;  %v871_v25 = vpop.permute.xlu2 %870 }
 0xda6   :  { %v1960_v18 = vadd.f32 %v871_v25, %v855_v37 }
 0xda7   :  { %1449 = vtanh.f32 %v1958_v30  ;;  %v970_v33 = vrot.slane %v1958_v30, 7 }
 0xda8   :  { %1451 = vtanh.f32 %v1960_v18 }
 0xdad   :  { %v1450_v38 = vpop.eup %1449 }
 0xdae   :  { %v1452_v39 = vpop.eup %1451  ;;  %880 = vrot.lane.b32.xlu0 %v1450_v38, %s1679_s4  ;;  %v971_v38 = vrot.slane %v1960_v18, 7 }
 0xdaf   :  { %882 = vrot.lane.b32.xlu1 %v1452_v39, %s1679_s4 }
 0xe20   :  { %v881_v36 = vpop.permute.xlu0 %880 }
 0xe21   :  { %v883_v21 = vpop.permute.xlu1 %882  ;;  %v886_v40 = vmul.f32 %v881_v36, %v846_v27 }
 0xe22   :  { %v887_v41 = vmul.f32 %v883_v21, %v847_v12 }
 0xe23   :  { %v890_v42 = vrot.slane %v886_v40, 5 }
 0xe24   :  { %v891_v43 = vrot.slane %v887_v41, 4 }
 0xe26   :  { %v892_v0 = vsel %vm293_vm12, %v891_v43, %v890_v42 }
 0xe27   :  { %893 = vrot.lane.b32.xlu2 %v892_v0, %s1680_s22 }
 0xe81   :  { %v894_v8 = vpop.permute.xlu2 %893 }
 0xe82   :  { %1354 = vmatmul.msk.f32.vlgmr.msra.gmra.mxu2 %vm182_vm13, %v894_v8 }
 0xf05   :  { %v914_v10 = vpop.f32.mrf.mxu2 }
 0xf06   :  { %v918_v11 = vrot.slane %v914_v10, 2  ;;  %v919_v44 = vrot.slane %v914_v10, 3 }
 0xf08   :  { %v922_v45 = vadd.f32 %v918_v11, %v1792_v19  ;;  %v923_v46 = vadd.f32 %v919_v44, %v1798_v23  ;;  %v1994_v11 = vld [vmem:[#allocation10] ss:$8 sm:$0x3] }
 0xf09   :  { %v116_v44 = vperm.slane %v1994_v11, 1 }
 0xf0a   :  { %v924_v47 = vmul.f32 %v922_v45, %v1796_v22  ;;  %v925_v48 = vmul.f32 %v923_v46, %v1796_v22 }
 0xf0b   :  { %v166_v45 = vadd.f32 %v1940_v2, %v116_v44 }
 0xf0c   :  { %v1355_v49 = vmul.f32 -1.442695, %v924_v47  ;;  %v1356_v50 = vmul.f32 -1.442695, %v925_v48 }
 0xf0d   :  { %v1128_v46 = vmul.f32 %v1796_v22, %v166_v45 }
 0xf0e   :  { %1453 = vpow2.f32 %v1355_v49 }
 0xf0f   :  { %1455 = vpow2.f32 %v1356_v50  ;;  %v1360_v47 = vmul.f32 -1.442695, %v1128_v46 }
 0xf14   :  { %v1454_v51 = vpop.eup %1453 }
 0xf15   :  { %v1456_v52 = vpop.eup %1455  ;;  %v932_v53 = vadd.f32 1.0, %v1454_v51 }
 0xf16   :  { %v933_v54 = vadd.f32 1.0, %v1456_v52 }
 0xf17   :  { %1457 = vrcp.f32 %v932_v53  ;;  %v945_v62 = vand.u32 2147483648, %v932_v53  ;;  %v943_v3 = vand.u32 2147483647, %v932_v53  ;;  %vm939_vm1 = vweird.f32 %v932_v53 }
 0xf18   :  { %1459 = vrcp.f32 %v933_v54  ;;  %v960_v63 = vand.u32 2147483648, %v933_v54  ;;  %v958_v7 = vand.u32 2147483647, %v933_v54  ;;  %vm954_vm2 = vweird.f32 %v933_v54 }
 0xf19   :  { %v946_v15 = vor.u32 1.1754944e-38, %v945_v62  ;;  %vm944_vm0 = vcmp.eq.f32.partialorder %v943_v3, 8.507059e+37 }
 0xf1a   :  { %v961_v16 = vor.u32 1.1754944e-38, %v960_v63  ;;  %vm959_vm5 = vcmp.eq.f32.partialorder %v958_v7, 8.507059e+37 }
 0xf1d   :  { %v1458_v56 = vpop.eup %1457 }
 0xf1e   :  { %v1460_v57 = vpop.eup %1459  ;;  %v935_v58 = vmul.f32 %v1458_v56, %v932_v53  ;;  %vm940_vm14 = vweird.f32 %v1458_v56 }
 0xf1f   :  { %v950_v59 = vmul.f32 %v1460_v57, %v933_v54  ;;  %vm955_vm15 = vweird.f32 %v1460_v57  ;;  %vm941_vm3 = vmor %vm939_vm1, %vm940_vm14 }
 0xf20   :  { %v936_v60 = vsub.f32 1.0, %v935_v58  ;;  %vm956_vm4 = vmor %vm954_vm2, %vm955_vm15 }
 0xf21   :  { %v951_v61 = vsub.f32 1.0, %v950_v59 }
 0xf22   :  { %v937_v1 = vmul.f32 %v1458_v56, %v936_v60 }
 0xf23   :  { %v952_v4 = vmul.f32 %v1460_v57, %v951_v61 }
 0xf24   :  { %v938_v9 = vadd.f32 %v1458_v56, %v937_v1 }
 0xf25   :  { %v953_v14 = vadd.f32 %v1460_v57, %v952_v4 }
 0xf26   :  { %v942_v17 = vsel %vm941_vm3, %v1458_v56, %v938_v9 }
 0xf27   :  { %v957_v20 = vsel %vm956_vm4, %v1460_v57, %v953_v14  ;;  %v947_v6 = vsel %vm944_vm0, %v946_v15, %v942_v17 }
 0xf28   :  { %v962_v24 = vsel %vm959_vm5, %v961_v16, %v957_v20  ;;  %v964_v26 = vmul.f32 %v947_v6, %v1796_v22 }
 0xf29   :  { %v965_v27 = vmul.f32 %v962_v24, %v1796_v22 }
 0xf2a   :  { %v966_v12 = vadd.f32 %v964_v26, %v1808_v55 }
 0xf2b   :  { %v967_v28 = vadd.f32 %v965_v27, %v1808_v55 }
 0xf2c   :  { %978 = vrot.lane.b32.xlu0 %v966_v12, %s1679_s4  ;;  %v974_v34 = vmul.f32 %v970_v33, %v966_v12 }
 0xf2d   :  { %980 = vrot.lane.b32.xlu1 %v967_v28, %s1679_s4  ;;  %v975_v39 = vmul.f32 %v971_v38, %v967_v28 }
 0xf9e   :  { %v979_v13 = vpop.permute.xlu0 %978 }
 0xf9f   :  { %v981_v29 = vpop.permute.xlu1 %980  ;;  %v984_v31 = vmul.f32 %v979_v13, %v966_v12 }
 0xfa0   :  { %v985_v32 = vmul.f32 %v981_v29, %v967_v28 }
 0xfa1   :  { %988 = vrot.lane.b32.xlu2 %v984_v31, %s1680_s22 }
 0xfa2   :  { %990 = vrot.lane.b32.xlu0 %v985_v32, %s1680_s22 }
 0xffb   :  { %v989_v35 = vpop.permute.xlu2 %988 }
 0xffc   :  { %v1982_v37 = vadd.f32 %v989_v35, %v974_v34 }
 0xffe   :  { %1461 = vtanh.f32 %v1982_v37 }
0x1004   :  { %v1462_v25 = vpop.eup %1461 }
0x1005   :  { %1000 = vrot.lane.b32.xlu1 %v1462_v25, %s1679_s4 }
0x1014   :  { %v991_v36 = vpop.permute.xlu0 %990 }
0x1015   :  { %v1987_v21 = vadd.f32 %v991_v36, %v975_v39 }
0x1017   :  { %1463 = vtanh.f32 %v1987_v21 }
0x1018   :  { %1465 = vpow2.f32 %v1360_v47 }
0x101d   :  { %v1464_v40 = vpop.eup %1463 }
0x101e   :  { %1002 = vrot.lane.b32.xlu2 %v1464_v40, %s1679_s4  ;;  %v1466_v49 = vpop.eup %1465 }
0x101f   :  { %v1136_v54 = vadd.f32 1.0, %v1466_v49 }
0x1021   :  { %1467 = vrcp.f32 %v1136_v54  ;;  %vm1143_vm6 = vweird.f32 %v1136_v54  ;;  %v1149_v13 = vand.u32 2147483648, %v1136_v54  ;;  %v1147_v32 = vand.u32 2147483647, %v1136_v54 }
0x1023   :  { %v1150_v36 = vor.u32 1.1754944e-38, %v1149_v13  ;;  %vm1148_vm4 = vcmp.eq.f32.partialorder %v1147_v32, 8.507059e+37 }
0x1027   :  { %v1468_v2 = vpop.eup %1467 }
0x1028   :  { %v1139_v1 = vmul.f32 %v1468_v2, %v1136_v54  ;;  %vm1144_vm7 = vweird.f32 %v1468_v2 }
0x1029   :  { %vm2005_vm11 = vmor %vm1143_vm6, %vm1144_vm7 }
0x1077   :  { %v1001_v30 = vpop.permute.xlu1 %1000 }
0x1078   :  { %v1003_v41 = vpop.permute.xlu2 %1002  ;;  %v1006_v42 = vmul.f32 %v1001_v30, %v966_v12 }
0x1079   :  { %v1007_v43 = vmul.f32 %v1003_v41, %v967_v28 }
0x107a   :  { %v1010_v0 = vrot.slane %v1006_v42, 6 }
0x107b   :  { %v1011_v8 = vrot.slane %v1007_v43, 5 }
0x107d   :  { %v1012_v10 = vsel %vm293_vm12, %v1011_v8, %v1010_v0 }
0x107e   :  { %1013 = vrot.lane.b32.xlu0 %v1012_v10, %s1680_s22  ;;  %v169_v10 = vadd.f32 %v1942_v5, %v116_v44 }
0x10f0   :  { %v1014_v18 = vpop.permute.xlu0 %1013 }
0x10f1   :  { %1357 = vmatmul.msk.f32.vlgmr.msra.gmra.mxu3 %vm182_vm13, %v1014_v18  ;;  %v1129_v18 = vmul.f32 %v1796_v22, %v169_v10 }
0x10f3   :  { %v1361_v45 = vmul.f32 -1.442695, %v1129_v18  ;;  %v1270_v18 = vld [vmem:[#allocation8 + $0x78] sm:$0xff] }
0x10f4   :  { %1287 = vmatpush.msrb.mxu2 %v1270_v18 }
0x1174   :  { %v1034_v48 = vpop.f32.mrf.mxu3 }
0x1175   :  { %v1038_v50 = vrot.slane %v1034_v48, 1  ;;  %v1039_v51 = vrot.slane %v1034_v48, 2 }
0x1177   :  { %v1042_v52 = vadd.f32 %v1038_v50, %v1792_v19  ;;  %v1043_v53 = vadd.f32 %v1039_v51, %v1798_v23  ;;  %v1140_v19 = vsub.f32 1.0, %v1139_v1  ;;  %v1091_v1 = vrot.slane %v1987_v21, 7 }
0x1179   :  { %v1044_v56 = vmul.f32 %v1042_v52, %v1796_v22  ;;  %v1045_v57 = vmul.f32 %v1043_v53, %v1796_v22  ;;  %v1141_v14 = vmul.f32 %v1468_v2, %v1140_v19 }
0x117b   :  { %v1358_v58 = vmul.f32 -1.442695, %v1044_v56  ;;  %v1359_v59 = vmul.f32 -1.442695, %v1045_v57  ;;  %v1142_v12 = vadd.f32 %v1468_v2, %v1141_v14 }
0x117d   :  { %1469 = vpow2.f32 %v1358_v58  ;;  %v1146_v30 = vsel %vm2005_vm11, %v1468_v2, %v1142_v12 }
0x117e   :  { %1471 = vpow2.f32 %v1359_v59  ;;  %v1151_v43 = vsel %vm1148_vm4, %v1150_v36, %v1146_v30 }
0x117f   :  { %v1168_v0 = vmul.f32 %v1151_v43, %v1796_v22  ;;  %v1199_v43 = vld [vmem:[#allocation8 + $0x28] sm:$0xff] }
0x1181   :  { %v2025_v8 = vadd.f32 %v1168_v0, %v1808_v55  ;;  %v1198_v0 = vld [vmem:[#allocation8 + $0x20] sm:$0xff] }
0x1183   :  { %v1470_v60 = vpop.eup %1469 }
0x1184   :  { %v1472_v61 = vpop.eup %1471  ;;  %v1052_v62 = vadd.f32 1.0, %v1470_v60 }
0x1185   :  { %v1053_v63 = vadd.f32 1.0, %v1472_v61 }
0x1186   :  { %1473 = vrcp.f32 %v1052_v62  ;;  %v1065_v16 = vand.u32 2147483648, %v1052_v62  ;;  %v1063_v6 = vand.u32 2147483647, %v1052_v62  ;;  %vm1059_vm10 = vweird.f32 %v1052_v62 }
0x1187   :  { %1475 = vrcp.f32 %v1053_v63  ;;  %v1080_v17 = vand.u32 2147483648, %v1053_v63  ;;  %v1078_v26 = vand.u32 2147483647, %v1053_v63  ;;  %vm1074_vm14 = vweird.f32 %v1053_v63 }
0x1188   :  { %v1066_v31 = vor.u32 1.1754944e-38, %v1065_v16  ;;  %vm1064_vm2 = vcmp.eq.f32.partialorder %v1063_v6, 8.507059e+37  ;;  %1477 = vpow2.f32 %v1361_v45  ;;  %v1203_v6 = vld [vmem:[#allocation8 + $0x48] sm:$0xff]  ;;  %v1269_v45 = vld [vmem:[#allocation8 + $0x70] sm:$0xff] }
0x1189   :  { %v1081_v33 = vor.u32 1.1754944e-38, %v1080_v17  ;;  %vm1079_vm3 = vcmp.eq.f32.partialorder %v1078_v26, 8.507059e+37  ;;  %v1205_v17 = vld [vmem:[#allocation8 + $0x58] sm:$0xff]  ;;  %1288 = vmatpush.msrb.mxu2 %v1269_v45 }
0x118a   :  { %1228 = vmatpush.msra.mxu0 %v1205_v17 }
0x118c   :  { %v1474_v23 = vpop.eup %1473 }
0x118d   :  { %v1476_v3 = vpop.eup %1475  ;;  %v1055_v4 = vmul.f32 %v1474_v23, %v1052_v62  ;;  %vm1060_vm8 = vweird.f32 %v1474_v23 }
0x118e   :  { %v1070_v7 = vmul.f32 %v1476_v3, %v1053_v63  ;;  %vm1075_vm9 = vweird.f32 %v1476_v3  ;;  %vm1061_vm15 = vmor %vm1059_vm10, %vm1060_vm8  ;;  %v1478_v46 = vpop.eup %1477 }
0x118f   :  { %v1056_v9 = vsub.f32 1.0, %v1055_v4  ;;  %vm1076_vm1 = vmor %vm1074_vm14, %vm1075_vm9  ;;  %v1137_v47 = vadd.f32 1.0, %v1478_v46  ;;  %v1268_v46 = vld [vmem:[#allocation8 + $0x68] sm:$0xff] }
0x1190   :  { %v1071_v15 = vsub.f32 1.0, %v1070_v7  ;;  %1289 = vmatpush.msrb.mxu2 %v1268_v46 }
0x1191   :  { %v1057_v20 = vmul.f32 %v1474_v23, %v1056_v9  ;;  %1479 = vrcp.f32 %v1137_v47  ;;  %vm1158_vm0 = vweird.f32 %v1137_v47  ;;  %v1164_v11 = vand.u32 2147483648, %v1137_v47 }
0x1192   :  { %v1072_v24 = vmul.f32 %v1476_v3, %v1071_v15  ;;  %v1162_v44 = vand.u32 2147483647, %v1137_v47 }
0x1193   :  { %v1058_v27 = vadd.f32 %v1474_v23, %v1057_v20  ;;  %v1165_v54 = vor.u32 1.1754944e-38, %v1164_v11  ;;  %v1204_v20 = vld [vmem:[#allocation8 + $0x50] sm:$0xff]  ;;  %v1271_v11 = vld [vmem:[#allocation10 + $0x2] ss:$0 sm:$0xff] }
0x1194   :  { %v1073_v29 = vadd.f32 %v1476_v3, %v1072_v24  ;;  %vm1163_vm7 = vcmp.eq.f32.partialorder %v1162_v44, 8.507059e+37  ;;  %1229 = vmatpush.msra.mxu0 %v1204_v20  ;;  %v1202_v24 = vld [vmem:[#allocation8 + $0x40] sm:$0xff] }
0x1195   :  { %v1062_v34 = vsel %vm1061_vm15, %v1474_v23, %v1058_v27 }
0x1196   :  { %v1077_v35 = vsel %vm1076_vm1, %v1476_v3, %v1073_v29  ;;  %v1067_v25 = vsel %vm1064_vm2, %v1066_v31, %v1062_v34  ;;  %1230 = vmatpush.msra.mxu0 %v1203_v6 }
0x1197   :  { %v1082_v38 = vsel %vm1079_vm3, %v1081_v33, %v1077_v35  ;;  %v1084_v39 = vmul.f32 %v1067_v25, %v1796_v22  ;;  %v1480_v50 = vpop.eup %1479 }
0x1198   :  { %v1085_v40 = vmul.f32 %v1082_v38, %v1796_v22  ;;  %v1154_v51 = vmul.f32 %v1480_v50, %v1137_v47  ;;  %vm1159_vm5 = vweird.f32 %v1480_v50  ;;  %1231 = vmatpush.msra.mxu0 %v1202_v24  ;;  %v1267_v47 = vld [vmem:[#allocation8 + $0x60] sm:$0xff] }
0x1199   :  { %v2014_v41 = vadd.f32 %v1084_v39, %v1808_v55  ;;  %vm1160_vm6 = vmor %vm1158_vm0, %vm1159_vm5  ;;  %1290 = vmatpush.msrb.mxu2 %v1267_v47 }
0x119a   :  { %v2017_v42 = vadd.f32 %v1085_v40, %v1808_v55  ;;  %v1155_v52 = vsub.f32 1.0, %v1154_v51 }
0x119b   :  { %1098 = vrot.lane.b32.xlu1 %v2014_v41, %s1679_s4 }
0x119c   :  { %1100 = vrot.lane.b32.xlu2 %v2017_v42, %s1679_s4  ;;  %v1156_v53 = vmul.f32 %v1480_v50, %v1155_v52  ;;  %v1095_v19 = vmul.f32 %v1091_v1, %v2017_v42 }
0x119e   :  { %v1157_v5 = vadd.f32 %v1480_v50, %v1156_v53 }
0x11a0   :  { %v1161_v56 = vsel %vm1160_vm6, %v1480_v50, %v1157_v5 }
0x11a1   :  { %v1166_v59 = vsel %vm1163_vm7, %v1165_v54, %v1161_v56 }
0x11a2   :  { %v1169_v60 = vmul.f32 %v1166_v59, %v1796_v22  ;;  %v1090_v22 = vrot.slane %v1982_v37, 7 }
0x11a4   :  { %1174 = vrot.lane.b32.xlu2 %v2025_v8, %s1679_s4  ;;  %v1171_v62 = vadd.f32 %v1169_v60, %v1808_v55  ;;  %v1094_v55 = vmul.f32 %v1090_v22, %v2014_v41 }
0x11f6   :  { %v1101_v48 = vpop.permute.xlu2 %1100 }
0x11f7   :  { %v1105_v49 = vmul.f32 %v1101_v48, %v2017_v42 }
0x11f9   :  { %1110 = vrot.lane.b32.xlu1 %v1105_v49, %s1680_s22  ;;  %v1206_v49 = vld [vmem:[#allocation10 + $0x1] ss:$0 sm:$0xff] }
0x11fe   :  { %v1175_v2 = vpop.permute.xlu2 %1174 }
0x11ff   :  { %v1180_v61 = vmul.f32 %v1175_v2, %v2025_v8 }
0x1201   :  { %1481 = vtanh.f32 %v1180_v61 }
0x1207   :  { %v1482_v63 = vpop.eup %1481 }
0x120d   :  { %v1099_v57 = vpop.permute.xlu1 %1098 }
0x120e   :  { %v1104_v58 = vmul.f32 %v1099_v57, %v2014_v41 }
0x1210   :  { %1108 = vrot.lane.b32.xlu0 %v1104_v58, %s1680_s22 }
0x1218   :  { %1176 = vrot.lane.b32.xlu0 %v1171_v62, %s1679_s4 }
0x1220   :  { %1186 = vrot.lane.b32.xlu0 %v1482_v63, %s1681_s23 }
0x126b   :  { %v1111_v23 = vpop.permute.xlu1 %1110 }
0x126c   :  { %v1115_v3 = vadd.f32 %v1111_v23, %v1095_v19 }
0x126e   :  { %1483 = vtanh.f32 %v1115_v3 }
0x1274   :  { %v1484_v4 = vpop.eup %1483 }
0x1275   :  { %1122 = vrot.lane.b32.xlu2 %v1484_v4, %s1679_s4 }
0x1282   :  { %v1109_v7 = vpop.permute.xlu0 %1108 }
0x1283   :  { %v1114_v9 = vadd.f32 %v1109_v7, %v1094_v55 }
0x1285   :  { %1485 = vtanh.f32 %v1114_v9 }
0x128a   :  { %v1177_v14 = vpop.permute.xlu0 %1176 }
0x128b   :  { %v1486_v15 = vpop.eup %1485  ;;  %v1181_v16 = vmul.f32 %v1177_v14, %v1171_v62 }
0x128c   :  { %1120 = vrot.lane.b32.xlu1 %v1486_v15, %s1679_s4 }
0x128d   :  { %1487 = vtanh.f32 %v1181_v16 }
0x1292   :  { %v1187_v13 = vpop.permute.xlu0 %1186 }
0x1293   :  { %v1488_v21 = vpop.eup %1487  ;;  %v1192_v31 = vmul.f32 %v1187_v13, %v2025_v8 }
0x1294   :  { %1188 = vrot.lane.b32.xlu1 %v1488_v21, %s1681_s23 }
0x1295   :  { %v1196_v25 = vmax.f32 %v1192_v31, 0.0 }
0x1297   :  { %v1209_v36 = vrot.slane %v1196_v25, 7 }
0x12cf   :  { %v1123_v37 = vpop.permute.xlu2 %1122 }
0x12d0   :  { %v1127_v26 = vmul.f32 %v1123_v37, %v2017_v42  ;;  %v1200_v42 = vld [vmem:[#allocation8 + $0x30] sm:$0xff] }
0x12d2   :  { %v1195_v12 = vmax.f32 %v1127_v26, 0.0 }
0x12d4   :  { %v1239_v32 = vrot.slane %v1195_v12, 6 }
0x12fe   :  { %v1121_v27 = vpop.permute.xlu1 %1120 }
0x12ff   :  { %v1126_v28 = vmul.f32 %v1121_v27, %v2014_v41  ;;  %v1201_v41 = vld [vmem:[#allocation8 + $0x38] sm:$0xff] }
0x1300   :  { %1257 = vmatpush.msra.mxu1 %v1201_v41 }
0x1301   :  { %v1194_v29 = vmax.f32 %v1126_v28, 0.0 }
0x1302   :  { %1258 = vmatpush.msra.mxu1 %v1200_v42 }
0x1303   :  { %v1238_v33 = vrot.slane %v1194_v29, 7 }
0x1304   :  { %1259 = vmatpush.msra.mxu1 %v1199_v43 }
0x1305   :  { %v1240_v34 = vsel %vm293_vm12, %v1239_v32, %v1238_v33 }
0x1306   :  { %1241 = vrot.lane.b32.xlu0 %v1240_v34, %s1680_s22  ;;  %v1189_v35 = vpop.permute.xlu1 %1188  ;;  %1260 = vmatpush.msra.mxu1 %v1198_v0 }
0x1307   :  { %v1193_v38 = vmul.f32 %v1189_v35, %v1171_v62 }
0x1309   :  { %v1197_v39 = vmax.f32 %v1193_v38, 0.0 }
0x130b   :  { %v1210_v40 = vrot.slane %v1197_v39, 6 }
0x130d   :  { %v1211_v30 = vsel %vm293_vm12, %v1210_v40, %v1209_v36 }
0x130e   :  { %1212 = vrot.lane.b32.xlu2 %v1211_v30, %s1680_s22 }
0x1368   :  { %v1213_v8 = vpop.permute.xlu2 %1212 }
0x1369   :  { %1362 = vmatmul.msk.f32.vlgmr.msra.gmra.mxu0 %vm182_vm13, %v1213_v8 }
0x1378   :  { %v1242_v10 = vpop.permute.xlu0 %1241 }
0x1379   :  { %1363 = vmatmul.msk.f32.vlgmr.msra.gmra.mxu1 %vm182_vm13, %v1242_v10 }
0x13e6   :  { %v1233_v48 = vpop.f32.mrf.mxu0 }
0x13f6   :  { %v1262_v50 = vpop.f32.mrf.mxu1 }
0x13f7   :  { %v1263_v51 = vadd.f32 %v1262_v50, %v1233_v48 }
0x13f9   :  { %v1265_v52 = vadd.f32 %v1263_v51, %v1206_v49 }
0x13fb   :  { %v1266_v53 = vmax.f32 %v1265_v52, 0.0 }
0x13fd   :  { %1364 = vmatmul.msk.f32.vlgmr.msrb.gmra.mxu2 %vm182_vm13, %v1266_v53 }
0x1480   :  { %v1292_v5 = vpop.f32.mrf.mxu2 }
0x1481   :  { %v1293_v44 = vadd.f32 %v1292_v5, %v1271_v11 }
0x1483   :  { %1295 = vst [vmem:[#allocation12] sm:$0x3] %v1293_v44 }
0x1484   :  { %1319 = dma.vmem_to_hbm [thread:$0]  %s1315_s8, 32, %s1317_s1, [#allocation13]  }
0x1485   :  { %1664 = dma.done.wait [#allocation4], 256  }
0x1486   :  { %1665 = vsyncadd [#allocation4], 4294967040 }
0x1487   :  { %1666 = dma.done.wait [#allocation13], 32  }
0x1488   :  { %1667 = vsyncadd [#allocation13], 4294967264 }
0x1489   :  { %1328 = vsyncpa [#allocation3], 1 }
0x148a   :  { %1329 = vsyncpa [#allocation6], 1 }
0x148b   :  { %1330 = vsyncpa [#allocation9], 1 }
0x148c   :  { %1331 = vsyncpa [#allocation4], 1 }
0x148d   :  { %1332 = vsyncpa [#allocation13], 1 }

</bundles_post_ra>
